<compile_context>
chip_gen: v7x
topology: tpu7x:2x2x1
jax: 0.10.0
libtpu: 0.0.40
codegen_flags: <defaults>
</compile_context>

<pallas_src>
import math
import functools

import jax
import jax.numpy as jnp
from jax import lax
from jax.experimental import pallas as pl
from jax.experimental.pallas import tpu as pltpu

LN_EPS = 1e-5  # torch.nn.LayerNorm default


def _layernorm(x, gamma, beta):
    mean = jnp.mean(x, axis=-1, keepdims=True)
    var = jnp.mean((x - mean) ** 2, axis=-1, keepdims=True)
    return (x - mean) * lax.rsqrt(var + LN_EPS) * gamma + beta


def _new_gelu(x):
    c = math.sqrt(2.0 / math.pi)
    return 0.5 * x * (1.0 + jnp.tanh(c * (x + 0.044715 * x ** 3)))


# ------------------------------- kernel -------------------------------------
def encoder_kernel(num_heads, seq_valid,
                   x_ref, small_ref, qkv_b_ref, fc1_b_ref,
                   qkv_w_ref, out_w_ref, fc1_w_ref, fc2_w_ref,
                   o_ref):
    layer = pl.program_id(1)

    # Running hidden state lives in o_ref (same output block across the layer
    # axis).  Output windows are not HBM-loaded, so seed from x at layer 0.
    @pl.when(layer == 0)
    def _():
        o_ref[...] = x_ref[...]

    bb, s_pad, hidden = o_ref.shape
    head_dim = hidden // num_heads
    rows = bb * s_pad

    x = o_ref[...].reshape(rows, hidden)                 # (R, H) f32

    sm = small_ref[0]                                    # (6, H) f32
    ln1_g, ln1_b = sm[0:1, :], sm[1:2, :]
    ln2_g, ln2_b = sm[2:3, :], sm[3:4, :]
    out_b, fc2_b = sm[4:5, :], sm[5:6, :]

    # -------- attention: LN1 -> merged QKV (scale folded into Q) -> SDPA -----
    h = _layernorm(x, ln1_g, ln1_b)
    qkv = jnp.dot(h.astype(jnp.bfloat16), qkv_w_ref[0],
                  preferred_element_type=jnp.float32) + qkv_b_ref[0]  # (R, 3H)
    qkv3 = qkv.reshape(bb, s_pad, 3 * hidden).astype(jnp.bfloat16)

    if seq_valid != s_pad:  # static: only compiled when the sequence is padded
        kpos = lax.broadcasted_iota(jnp.int32, (1, 1, s_pad), 2)
        key_bias = jnp.where(kpos < seq_valid, 0.0, -1e30).astype(jnp.float32)
    else:
        key_bias = None

    ctx_heads = []
    for n in range(num_heads):
        q = qkv3[:, :, n * head_dim:(n + 1) * head_dim]
        k = qkv3[:, :, hidden + n * head_dim:hidden + (n + 1) * head_dim]
        v = qkv3[:, :, 2 * hidden + n * head_dim:2 * hidden + (n + 1) * head_dim]
        sc = jnp.einsum('bqd,bkd->bqk', q, k,
                        preferred_element_type=jnp.float32)   # (Bb, S, S)
        if key_bias is not None:
            sc = sc + key_bias
        sc = sc - jnp.max(sc, axis=-1, keepdims=True)
        p = jnp.exp(sc)
        p = p / jnp.sum(p, axis=-1, keepdims=True)            # exact softmax
        ctx_heads.append(jnp.einsum('bqk,bkd->bqd', p.astype(jnp.bfloat16), v,
                                    preferred_element_type=jnp.float32))

    attn = jnp.concatenate(ctx_heads, axis=-1).reshape(rows, hidden)   # f32
    attn = jnp.dot(attn.astype(jnp.bfloat16), out_w_ref[0],
                   preferred_element_type=jnp.float32) + out_b
    # attn_dropout / output_dropout are identity in eval mode
    x = x + attn

    # -------- MLP: LN2 -> dense_1 -> NewGELU -> dense_3 ----------------------
    h2 = _layernorm(x, ln2_g, ln2_b)
    m = jnp.dot(h2.astype(jnp.bfloat16), fc1_w_ref[0],
                preferred_element_type=jnp.float32) + fc1_b_ref[0]
    m = _new_gelu(m)
    m = jnp.dot(m.astype(jnp.bfloat16), fc2_w_ref[0],
                preferred_element_type=jnp.float32) + fc2_b
    x = x + m

    o_ref[...] = x.reshape(bb, s_pad, hidden)


# --------------------------- VMEM budgeting ----------------------------------
def _physical_vmem_bytes():
    try:
        info = pltpu.get_tpu_info()
        for name in ("vmem_capacity_bytes", "vmem_bytes", "vmem_size_bytes"):
            v = getattr(info, name, None)
            if v:
                return int(v)
    except Exception:
        pass
    return 64 << 20  # conservative fallback (v7x per-TC VMEM)


def _estimate_vmem_bytes(bb, s_pad, h, i, num_heads):
    """Resident-set estimate: 2x per-layer params + 2x x/out blocks + 1x temps."""
    r = bb * s_pad
    w_bf16 = 2 * (h * 3 * h + h * h + h * i + i * h)   # per-layer weights (bf16)
    vec_f32 = 4 * (9 * h + i)                          # per-layer vectors (f32)
    resident = 2 * (w_bf16 + vec_f32)                  # double-buffered params
    resident += 2 * r * h * 4                          # double-buffered x input
    resident += 2 * r * h * 4                          # resident output block
    tmp = r * 3 * h * 6                                # qkv (f32 + bf16)
    tmp += r * h * 6 * 2                               # LN outputs (f32 + bf16)
    tmp += bb * s_pad * s_pad * 10                     # live per-head scores/probs
    tmp += r * h * 4 * 2                               # head contexts + attn
    tmp += r * i * 6                                   # MLP intermediate
    tmp += r * h * 4 * 2                               # residual copies / misc
    return int(1.3 * (resident + tmp)) + (4 << 20)


# ------------------------------- wrapper -------------------------------------
def encoder_forward(x, params, num_heads):
    B, S, H = x.shape
    L = params['qkv_w'].shape[0]
    I = params['fc1_w'].shape[-1]
    head_dim = H // num_heads

    # Pad the sequence to a multiple of 8 (sublane-friendly); masked in-kernel.
    S_pad = ((S + 7) // 8) * 8
    x_in = x if S_pad == S else jnp.pad(x, ((0, 0), (0, S_pad - S), (0, 0)))

    # Fold 1/sqrt(head_dim) into the Q columns of the QKV projection.
    scale = 1.0 / math.sqrt(head_dim)
    qkv_w = params['qkv_w'].astype(jnp.float32).at[:, :, :H].multiply(scale)
    qkv_b = params['qkv_b'].astype(jnp.float32).at[:, :H].multiply(scale)

    # bf16 weights: half the weight-DMA bytes, f32 MXU accumulation in-kernel.
    qkv_w = qkv_w.astype(jnp.bfloat16)             # (L, H, 3H)
    out_w = params['out_w'].astype(jnp.bfloat16)   # (L, H, H)
    fc1_w = params['fc1_w'].astype(jnp.bfloat16)   # (L, H, I)
    fc2_w = params['fc2_w'].astype(jnp.bfloat16)   # (L, I, H)

    # Pack the six H-wide per-layer vectors into a single input.
    small = jnp.stack([params['ln1_g'], params['ln1_b'],
                       params['ln2_g'], params['ln2_b'],
                       params['out_b'], params['fc2_b']],
                      axis=1).astype(jnp.float32)  # (L, 6, H)
    qkv_b = qkv_b[:, None, :]                                   # (L, 1, 3H)
    fc1_b = params['fc1_b'].astype(jnp.float32)[:, None, :]     # (L, 1, I)

    # Generation-aware batch-block size and VMEM limit.
    phys_vmem = _physical_vmem_bytes()
    cap = int(phys_vmem * 0.8)       # headroom for compiler scratch (esp. v7x)
    bb = 1
    for d in range(1, B + 1):
        if B % d == 0 and d <= 8 and _estimate_vmem_bytes(d, S_pad, H, I, num_heads) <= cap:
            bb = d
    need = _estimate_vmem_bytes(bb, S_pad, H, I, num_heads)
    vmem_limit = max(32 << 20, min(need, cap))

    grid = (B // bb, L)

    in_specs = [
        pl.BlockSpec((bb, S_pad, H), lambda b, l: (b, 0, 0)),     # x
        pl.BlockSpec((1, 6, H), lambda b, l: (l, 0, 0)),          # packed vecs
        pl.BlockSpec((1, 1, 3 * H), lambda b, l: (l, 0, 0)),      # qkv_b
        pl.BlockSpec((1, 1, I), lambda b, l: (l, 0, 0)),          # fc1_b
        pl.BlockSpec((1, H, 3 * H), lambda b, l: (l, 0, 0)),      # qkv_w
        pl.BlockSpec((1, H, H), lambda b, l: (l, 0, 0)),          # out_w
        pl.BlockSpec((1, H, I), lambda b, l: (l, 0, 0)),          # fc1_w
        pl.BlockSpec((1, I, H), lambda b, l: (l, 0, 0)),          # fc2_w
    ]
    out_spec = pl.BlockSpec((bb, S_pad, H), lambda b, l: (b, 0, 0))

    per_layer_bytes = (9 * H + I) * 4 + (H * 3 * H + H * H + 2 * H * I) * 2
    matmul_flops = 2 * S_pad * (3 * H * H + 2 * S_pad * H + H * H + 2 * H * I)
    cost = pl.CostEstimate(
        flops=int(B * L * matmul_flops),
        transcendentals=int(B * L * (num_heads * S_pad * S_pad + S_pad * I + 2 * S_pad)),
        bytes_accessed=int((B // bb) * L * per_layer_bytes + 2 * B * S_pad * H * 4),
    )

    out = pl.pallas_call(
        functools.partial(encoder_kernel, num_heads, S),
        out_shape=jax.ShapeDtypeStruct((B, S_pad, H), jnp.float32),
        grid_spec=pltpu.PrefetchScalarGridSpec(
            num_scalar_prefetch=0,
            grid=grid,
            in_specs=in_specs,
            out_specs=out_spec,
        ),
        compiler_params=pltpu.CompilerParams(
            dimension_semantics=("parallel", "arbitrary"),
            vmem_limit_bytes=int(vmem_limit)),
        cost_estimate=cost,
    )(x_in, small, qkv_b, fc1_b, qkv_w, out_w, fc1_w, fc2_w)

    return out if S_pad == S else out[:, :S, :]


# ----------------------------- pure-JAX reference ---------------------------
def encoder_reference(x, params, num_heads):
    L = params['qkv_w'].shape[0]
    B, S, H = x.shape
    head_dim = H // num_heads

    def linear(h, w, b):
        y = jnp.dot(h.reshape(B * S, -1), w) + b
        return y.reshape(B, S, -1)

    for l in range(L):
        h = _layernorm(x, params['ln1_g'][l], params['ln1_b'][l])
        qkv = linear(h, params['qkv_w'][l], params['qkv_b'][l])
        q, k, v = qkv[..., :H], qkv[..., H:2 * H], qkv[..., 2 * H:]
        q = q.reshape(B, S, num_heads, head_dim).transpose(0, 2, 1, 3)
        k = k.reshape(B, S, num_heads, head_dim).transpose(0, 2, 1, 3)
        v = v.reshape(B, S, num_heads, head_dim).transpose(0, 2, 1, 3)
        scores = jnp.einsum('bhqd,bhkd->bhqk', q, k) / math.sqrt(head_dim)
        probs = jax.nn.softmax(scores, axis=-1)
        attn = jnp.einsum('bhqk,bhkd->bhqd', probs, v)
        attn = attn.transpose(0, 2, 1, 3).reshape(B, S, H)
        attn = linear(attn, params['out_w'][l], params['out_b'][l])
        x = x + attn
        h2 = _layernorm(x, params['ln2_g'][l], params['ln2_b'][l])
        m = linear(h2, params['fc1_w'][l], params['fc1_b'][l])
        m = _new_gelu(m)
        m = linear(m, params['fc2_w'][l], params['fc2_b'][l])
        x = x + m
    return x


# ----------------------------- parameter init -------------------------------
def init_params(key, num_layers, hidden, intermediate):
    ks = jax.random.split(key, 12)
    w_scale = 0.02

    def w(k, shape, s=w_scale):
        return (s * jax.random.normal(k, shape)).astype(jnp.float32)

    return {
        'ln1_g': (1.0 + 0.05 * jax.random.normal(ks[0], (num_layers, hidden))
                  ).astype(jnp.float32),
        'ln1_b': w(ks[1], (num_layers, hidden), 0.05),
        'ln2_g': (1.0 + 0.05 * jax.random.normal(ks[2], (num_layers, hidden))
                  ).astype(jnp.float32),
        'ln2_b': w(ks[3], (num_layers, hidden), 0.05),
        'qkv_w': w(ks[4], (num_layers, hidden, 3 * hidden)),
        'qkv_b': w(ks[5], (num_layers, 3 * hidden)),
        'out_w': w(ks[6], (num_layers, hidden, hidden)),
        'out_b': w(ks[7], (num_layers, hidden)),
        'fc1_w': w(ks[8], (num_layers, hidden, intermediate)),
        'fc1_b': w(ks[9], (num_layers, intermediate)),
        'fc2_w': w(ks[10], (num_layers, intermediate, hidden)),
        'fc2_b': w(ks[11], (num_layers, hidden)),
    }


if __name__ == "__main__":
    # Small ViT-encoder config: 2 layers, hidden=32, 4 heads, intermediate=64,
    # batch=2, sequence=8.
    B, S, H = 2, 8, 32
    NUM_HEADS = 4
    INTERMEDIATE = 64
    NUM_LAYERS = 2

    key = jax.random.PRNGKey(0)
    k_x, k_p = jax.random.split(key)
    x = jax.random.normal(k_x, (B, S, H), dtype=jnp.float32)
    params = init_params(k_p, NUM_LAYERS, H, INTERMEDIATE)

    ref = jax.block_until_ready(encoder_reference(x, params, NUM_HEADS))

    out = encoder_forward(x, params, NUM_HEADS)
    out = jax.block_until_ready(out)

    assert out.shape == (B, S, H)
    # bf16 matmul operands -> loosened tolerance vs f32 reference.
    assert jnp.max(jnp.abs(out - ref)) < 5e-2, "mismatch vs pure-JAX reference"

    print("KERNEL_OK")
</pallas_src>

<mosaic_0001>
module attributes {stable_mosaic.version = 11 : i64} {
  func.func @encoder_kernel(%arg0: i32, %arg1: i32, %arg2: memref<2x8x32xf32, #tpu.memory_space<vmem>>, %arg3: memref<1x6x32xf32, #tpu.memory_space<vmem>>, %arg4: memref<1x1x96xf32, #tpu.memory_space<vmem>>, %arg5: memref<1x1x64xf32, #tpu.memory_space<vmem>>, %arg6: memref<1x32x96xbf16, #tpu.memory_space<vmem>>, %arg7: memref<1x32x32xbf16, #tpu.memory_space<vmem>>, %arg8: memref<1x32x64xbf16, #tpu.memory_space<vmem>>, %arg9: memref<1x64x32xbf16, #tpu.memory_space<vmem>>, %arg10: memref<2x8x32xf32, #tpu.memory_space<vmem>>) attributes {dimension_semantics = [#tpu.dimension_semantics<parallel>, #tpu.dimension_semantics<arbitrary>], iteration_bounds = array<i64: 1, 2>, scalar_prefetch = 0 : i64, scratch_operands = 0 : i64, tpu.core_type = #tpu.core_type<tc>, window_params = [{transform_indices = @transform_0, window_bounds = array<i64: 2, 8, 32>}, {transform_indices = @transform_1, window_bounds = array<i64: 1, 6, 32>}, {transform_indices = @transform_2, window_bounds = array<i64: 1, 1, 96>}, {transform_indices = @transform_3, window_bounds = array<i64: 1, 1, 64>}, {transform_indices = @transform_4, window_bounds = array<i64: 1, 32, 96>}, {transform_indices = @transform_5, window_bounds = array<i64: 1, 32, 32>}, {transform_indices = @transform_6, window_bounds = array<i64: 1, 32, 64>}, {transform_indices = @transform_7, window_bounds = array<i64: 1, 64, 32>}, {transform_indices = @transform_8, window_bounds = array<i64: 2, 8, 32>}]} {
    %c0_i32 = arith.constant 0 : i32
    %0 = arith.cmpi eq, %arg1, %c0_i32 : i32
    %1 = arith.extui %0 : i1 to i32
    %c0_i32_0 = arith.constant 0 : i32
    %2 = arith.cmpi ne, %1, %c0_i32_0 : i32
    scf.if %2 {
      %c0_60 = arith.constant 0 : index
      %c0_61 = arith.constant 0 : index
      %c0_62 = arith.constant 0 : index
      %166 = vector.load %arg2[%c0_60, %c0_61, %c0_62] : memref<2x8x32xf32, #tpu.memory_space<vmem>>, vector<2x8x32xf32>
      %c0_63 = arith.constant 0 : index
      %c0_64 = arith.constant 0 : index
      %c0_65 = arith.constant 0 : index
      %167 = vector.load %arg10[%c0_63, %c0_64, %c0_65] : memref<2x8x32xf32, #tpu.memory_space<vmem>>, vector<2x8x32xf32>
      tpu.vector_store %arg10[%c0_63, %c0_64, %c0_65], %166 {strides = array<i32>} : memref<2x8x32xf32, #tpu.memory_space<vmem>>, vector<2x8x32xf32>,
    } else {
    }
    %c0 = arith.constant 0 : index
    %c0_1 = arith.constant 0 : index
    %c0_2 = arith.constant 0 : index
    %3 = vector.load %arg10[%c0, %c0_1, %c0_2] : memref<2x8x32xf32, #tpu.memory_space<vmem>>, vector<2x8x32xf32>
    %4 = vector.shape_cast %3 : vector<2x8x32xf32> to vector<16x32xf32>
    %c0_3 = arith.constant 0 : index
    %c0_4 = arith.constant 0 : index
    %c0_5 = arith.constant 0 : index
    %5 = vector.load %arg3[%c0_3, %c0_4, %c0_5] : memref<1x6x32xf32, #tpu.memory_space<vmem>>, vector<1x6x32xf32>
    %6 = vector.shape_cast %5 : vector<1x6x32xf32> to vector<6x32xf32>
    %7 = vector.extract_strided_slice %6 {offsets = [0, 0], sizes = [1, 32], strides = [1, 1]} : vector<6x32xf32> to vector<1x32xf32>
    %8 = vector.extract_strided_slice %6 {offsets = [1, 0], sizes = [1, 32], strides = [1, 1]} : vector<6x32xf32> to vector<1x32xf32>
    %9 = vector.extract_strided_slice %6 {offsets = [2, 0], sizes = [1, 32], strides = [1, 1]} : vector<6x32xf32> to vector<1x32xf32>
    %10 = vector.extract_strided_slice %6 {offsets = [3, 0], sizes = [1, 32], strides = [1, 1]} : vector<6x32xf32> to vector<1x32xf32>
    %11 = vector.extract_strided_slice %6 {offsets = [4, 0], sizes = [1, 32], strides = [1, 1]} : vector<6x32xf32> to vector<1x32xf32>
    %12 = vector.extract_strided_slice %6 {offsets = [5, 0], sizes = [1, 32], strides = [1, 1]} : vector<6x32xf32> to vector<1x32xf32>
    %cst = arith.constant dense<0.000000e+00> : vector<16xf32>
    %13 = vector.multi_reduction <add>, %4, %cst [1] : vector<16x32xf32> to vector<16xf32>
    %14 = vector.shape_cast %13 : vector<16xf32> to vector<16x1xf32>
    %cst_6 = arith.constant 3.200000e+01 : f32
    %15 = vector.broadcast %cst_6 : f32 to vector<16x1xf32>
    %16 = arith.divf %14, %15 : vector<16x1xf32>
    %17 = vector.broadcast %16 : vector<16x1xf32> to vector<16x32xf32>
    %18 = arith.subf %4, %17 : vector<16x32xf32>
    %19 = arith.mulf %18, %18 : vector<16x32xf32>
    %cst_7 = arith.constant dense<0.000000e+00> : vector<16xf32>
    %20 = vector.multi_reduction <add>, %19, %cst_7 [1] : vector<16x32xf32> to vector<16xf32>
    %21 = vector.shape_cast %20 : vector<16xf32> to vector<16x1xf32>
    %cst_8 = arith.constant 3.200000e+01 : f32
    %22 = vector.broadcast %cst_8 : f32 to vector<16x1xf32>
    %23 = arith.divf %21, %22 : vector<16x1xf32>
    %24 = vector.broadcast %16 : vector<16x1xf32> to vector<16x32xf32>
    %25 = arith.subf %4, %24 : vector<16x32xf32>
    %cst_9 = arith.constant 9.99999974E-6 : f32
    %26 = vector.broadcast %cst_9 : f32 to vector<16x1xf32>
    %27 = arith.addf %23, %26 : vector<16x1xf32>
    %28 = math.rsqrt %27 : vector<16x1xf32>
    %29 = vector.broadcast %28 : vector<16x1xf32> to vector<16x32xf32>
    %30 = arith.mulf %25, %29 : vector<16x32xf32>
    %31 = vector.broadcast %7 : vector<1x32xf32> to vector<16x32xf32>
    %32 = arith.mulf %30, %31 : vector<16x32xf32>
    %33 = vector.broadcast %8 : vector<1x32xf32> to vector<16x32xf32>
    %34 = arith.addf %32, %33 : vector<16x32xf32>
    %35 = arith.truncf %34 : vector<16x32xf32> to vector<16x32xbf16>
    %c0_10 = arith.constant 0 : index
    %c0_11 = arith.constant 0 : index
    %c0_12 = arith.constant 0 : index
    %36 = vector.load %arg6[%c0_10, %c0_11, %c0_12] : memref<1x32x96xbf16, #tpu.memory_space<vmem>>, vector<1x32x96xbf16>
    %37 = vector.shape_cast %36 : vector<1x32x96xbf16> to vector<32x96xbf16>
    %cst_13 = arith.constant dense<0.000000e+00> : vector<16x96xf32>
    %38 = tpu.matmul %35, %37, %cst_13 {dimension_numbers = #tpu.dot_dimension_numbers<[1], [0], [0], [1], [0, 0, 1, 1], [], []>} : vector<16x32xbf16>, vector<32x96xbf16>, vector<16x96xf32> -> vector<16x96xf32>
    %c0_14 = arith.constant 0 : index
    %c0_15 = arith.constant 0 : index
    %c0_16 = arith.constant 0 : index
    %39 = vector.load %arg4[%c0_14, %c0_15, %c0_16] : memref<1x1x96xf32, #tpu.memory_space<vmem>>, vector<1x1x96xf32>
    %40 = vector.shape_cast %39 : vector<1x1x96xf32> to vector<1x96xf32>
    %41 = vector.broadcast %40 : vector<1x96xf32> to vector<16x96xf32>
    %42 = arith.addf %38, %41 : vector<16x96xf32>
    %43 = vector.shape_cast %42 : vector<16x96xf32> to vector<2x8x96xf32>
    %44 = arith.truncf %43 : vector<2x8x96xf32> to vector<2x8x96xbf16>
    %45 = vector.extract_strided_slice %44 {offsets = [0, 0, 0], sizes = [2, 8, 8], strides = [1, 1, 1]} : vector<2x8x96xbf16> to vector<2x8x8xbf16>
    %46 = vector.extract_strided_slice %44 {offsets = [0, 0, 32], sizes = [2, 8, 8], strides = [1, 1, 1]} : vector<2x8x96xbf16> to vector<2x8x8xbf16>
    %47 = vector.extract_strided_slice %44 {offsets = [0, 0, 64], sizes = [2, 8, 8], strides = [1, 1, 1]} : vector<2x8x96xbf16> to vector<2x8x8xbf16>
    "tpu.trace_start"() <{level = 10 : i32, message = "bqd,bkd->bqk"}> : () -> ()
    %cst_17 = arith.constant dense<0.000000e+00> : vector<2x8x8xf32>
    %48 = tpu.matmul %45, %46, %cst_17 {dimension_numbers = #tpu.dot_dimension_numbers<[2], [2], [1], [1], [0, 0, 0, 1, 1, 1], [0], [0]>} : vector<2x8x8xbf16>, vector<2x8x8xbf16>, vector<2x8x8xf32> -> vector<2x8x8xf32>
    "tpu.trace_stop"() : () -> ()
    %cst_18 = arith.constant dense<0xFF800000> : vector<2x8xf32>
    %49 = vector.multi_reduction <maximumf>, %48, %cst_18 [2] : vector<2x8x8xf32> to vector<2x8xf32>
    %50 = vector.shape_cast %49 : vector<2x8xf32> to vector<2x8x1xf32>
    %51 = vector.broadcast %50 : vector<2x8x1xf32> to vector<2x8x8xf32>
    %52 = arith.subf %48, %51 : vector<2x8x8xf32>
    %53 = math.exp %52 : vector<2x8x8xf32>
    %cst_19 = arith.constant dense<0.000000e+00> : vector<2x8xf32>
    %54 = vector.multi_reduction <add>, %53, %cst_19 [2] : vector<2x8x8xf32> to vector<2x8xf32>
    %55 = vector.shape_cast %54 : vector<2x8xf32> to vector<2x8x1xf32>
    %56 = vector.broadcast %55 : vector<2x8x1xf32> to vector<2x8x8xf32>
    %57 = arith.divf %53, %56 : vector<2x8x8xf32>
    %58 = arith.truncf %57 : vector<2x8x8xf32> to vector<2x8x8xbf16>
    "tpu.trace_start"() <{level = 10 : i32, message = "bqk,bkd->bqd"}> : () -> ()
    %cst_20 = arith.constant dense<0.000000e+00> : vector<2x8x8xf32>
    %59 = tpu.matmul %58, %47, %cst_20 {dimension_numbers = #tpu.dot_dimension_numbers<[2], [1], [1], [2], [0, 0, 0, 1, 1, 2], [0], [0]>} : vector<2x8x8xbf16>, vector<2x8x8xbf16>, vector<2x8x8xf32> -> vector<2x8x8xf32>
    "tpu.trace_stop"() : () -> ()
    %60 = vector.extract_strided_slice %44 {offsets = [0, 0, 8], sizes = [2, 8, 8], strides = [1, 1, 1]} : vector<2x8x96xbf16> to vector<2x8x8xbf16>
    %61 = vector.extract_strided_slice %44 {offsets = [0, 0, 40], sizes = [2, 8, 8], strides = [1, 1, 1]} : vector<2x8x96xbf16> to vector<2x8x8xbf16>
    %62 = vector.extract_strided_slice %44 {offsets = [0, 0, 72], sizes = [2, 8, 8], strides = [1, 1, 1]} : vector<2x8x96xbf16> to vector<2x8x8xbf16>
    "tpu.trace_start"() <{level = 10 : i32, message = "bqd,bkd->bqk"}> : () -> ()
    %cst_21 = arith.constant dense<0.000000e+00> : vector<2x8x8xf32>
    %63 = tpu.matmul %60, %61, %cst_21 {dimension_numbers = #tpu.dot_dimension_numbers<[2], [2], [1], [1], [0, 0, 0, 1, 1, 1], [0], [0]>} : vector<2x8x8xbf16>, vector<2x8x8xbf16>, vector<2x8x8xf32> -> vector<2x8x8xf32>
    "tpu.trace_stop"() : () -> ()
    %cst_22 = arith.constant dense<0xFF800000> : vector<2x8xf32>
    %64 = vector.multi_reduction <maximumf>, %63, %cst_22 [2] : vector<2x8x8xf32> to vector<2x8xf32>
    %65 = vector.shape_cast %64 : vector<2x8xf32> to vector<2x8x1xf32>
    %66 = vector.broadcast %65 : vector<2x8x1xf32> to vector<2x8x8xf32>
    %67 = arith.subf %63, %66 : vector<2x8x8xf32>
    %68 = math.exp %67 : vector<2x8x8xf32>
    %cst_23 = arith.constant dense<0.000000e+00> : vector<2x8xf32>
    %69 = vector.multi_reduction <add>, %68, %cst_23 [2] : vector<2x8x8xf32> to vector<2x8xf32>
    %70 = vector.shape_cast %69 : vector<2x8xf32> to vector<2x8x1xf32>
    %71 = vector.broadcast %70 : vector<2x8x1xf32> to vector<2x8x8xf32>
    %72 = arith.divf %68, %71 : vector<2x8x8xf32>
    %73 = arith.truncf %72 : vector<2x8x8xf32> to vector<2x8x8xbf16>
    "tpu.trace_start"() <{level = 10 : i32, message = "bqk,bkd->bqd"}> : () -> ()
    %cst_24 = arith.constant dense<0.000000e+00> : vector<2x8x8xf32>
    %74 = tpu.matmul %73, %62, %cst_24 {dimension_numbers = #tpu.dot_dimension_numbers<[2], [1], [1], [2], [0, 0, 0, 1, 1, 2], [0], [0]>} : vector<2x8x8xbf16>, vector<2x8x8xbf16>, vector<2x8x8xf32> -> vector<2x8x8xf32>
    "tpu.trace_stop"() : () -> ()
    %75 = vector.extract_strided_slice %44 {offsets = [0, 0, 16], sizes = [2, 8, 8], strides = [1, 1, 1]} : vector<2x8x96xbf16> to vector<2x8x8xbf16>
    %76 = vector.extract_strided_slice %44 {offsets = [0, 0, 48], sizes = [2, 8, 8], strides = [1, 1, 1]} : vector<2x8x96xbf16> to vector<2x8x8xbf16>
    %77 = vector.extract_strided_slice %44 {offsets = [0, 0, 80], sizes = [2, 8, 8], strides = [1, 1, 1]} : vector<2x8x96xbf16> to vector<2x8x8xbf16>
    "tpu.trace_start"() <{level = 10 : i32, message = "bqd,bkd->bqk"}> : () -> ()
    %cst_25 = arith.constant dense<0.000000e+00> : vector<2x8x8xf32>
    %78 = tpu.matmul %75, %76, %cst_25 {dimension_numbers = #tpu.dot_dimension_numbers<[2], [2], [1], [1], [0, 0, 0, 1, 1, 1], [0], [0]>} : vector<2x8x8xbf16>, vector<2x8x8xbf16>, vector<2x8x8xf32> -> vector<2x8x8xf32>
    "tpu.trace_stop"() : () -> ()
    %cst_26 = arith.constant dense<0xFF800000> : vector<2x8xf32>
    %79 = vector.multi_reduction <maximumf>, %78, %cst_26 [2] : vector<2x8x8xf32> to vector<2x8xf32>
    %80 = vector.shape_cast %79 : vector<2x8xf32> to vector<2x8x1xf32>
    %81 = vector.broadcast %80 : vector<2x8x1xf32> to vector<2x8x8xf32>
    %82 = arith.subf %78, %81 : vector<2x8x8xf32>
    %83 = math.exp %82 : vector<2x8x8xf32>
    %cst_27 = arith.constant dense<0.000000e+00> : vector<2x8xf32>
    %84 = vector.multi_reduction <add>, %83, %cst_27 [2] : vector<2x8x8xf32> to vector<2x8xf32>
    %85 = vector.shape_cast %84 : vector<2x8xf32> to vector<2x8x1xf32>
    %86 = vector.broadcast %85 : vector<2x8x1xf32> to vector<2x8x8xf32>
    %87 = arith.divf %83, %86 : vector<2x8x8xf32>
    %88 = arith.truncf %87 : vector<2x8x8xf32> to vector<2x8x8xbf16>
    "tpu.trace_start"() <{level = 10 : i32, message = "bqk,bkd->bqd"}> : () -> ()
    %cst_28 = arith.constant dense<0.000000e+00> : vector<2x8x8xf32>
    %89 = tpu.matmul %88, %77, %cst_28 {dimension_numbers = #tpu.dot_dimension_numbers<[2], [1], [1], [2], [0, 0, 0, 1, 1, 2], [0], [0]>} : vector<2x8x8xbf16>, vector<2x8x8xbf16>, vector<2x8x8xf32> -> vector<2x8x8xf32>
    "tpu.trace_stop"() : () -> ()
    %90 = vector.extract_strided_slice %44 {offsets = [0, 0, 24], sizes = [2, 8, 8], strides = [1, 1, 1]} : vector<2x8x96xbf16> to vector<2x8x8xbf16>
    %91 = vector.extract_strided_slice %44 {offsets = [0, 0, 56], sizes = [2, 8, 8], strides = [1, 1, 1]} : vector<2x8x96xbf16> to vector<2x8x8xbf16>
    %92 = vector.extract_strided_slice %44 {offsets = [0, 0, 88], sizes = [2, 8, 8], strides = [1, 1, 1]} : vector<2x8x96xbf16> to vector<2x8x8xbf16>
    "tpu.trace_start"() <{level = 10 : i32, message = "bqd,bkd->bqk"}> : () -> ()
    %cst_29 = arith.constant dense<0.000000e+00> : vector<2x8x8xf32>
    %93 = tpu.matmul %90, %91, %cst_29 {dimension_numbers = #tpu.dot_dimension_numbers<[2], [2], [1], [1], [0, 0, 0, 1, 1, 1], [0], [0]>} : vector<2x8x8xbf16>, vector<2x8x8xbf16>, vector<2x8x8xf32> -> vector<2x8x8xf32>
    "tpu.trace_stop"() : () -> ()
    %cst_30 = arith.constant dense<0xFF800000> : vector<2x8xf32>
    %94 = vector.multi_reduction <maximumf>, %93, %cst_30 [2] : vector<2x8x8xf32> to vector<2x8xf32>
    %95 = vector.shape_cast %94 : vector<2x8xf32> to vector<2x8x1xf32>
    %96 = vector.broadcast %95 : vector<2x8x1xf32> to vector<2x8x8xf32>
    %97 = arith.subf %93, %96 : vector<2x8x8xf32>
    %98 = math.exp %97 : vector<2x8x8xf32>
    %cst_31 = arith.constant dense<0.000000e+00> : vector<2x8xf32>
    %99 = vector.multi_reduction <add>, %98, %cst_31 [2] : vector<2x8x8xf32> to vector<2x8xf32>
    %100 = vector.shape_cast %99 : vector<2x8xf32> to vector<2x8x1xf32>
    %101 = vector.broadcast %100 : vector<2x8x1xf32> to vector<2x8x8xf32>
    %102 = arith.divf %98, %101 : vector<2x8x8xf32>
    %103 = arith.truncf %102 : vector<2x8x8xf32> to vector<2x8x8xbf16>
    "tpu.trace_start"() <{level = 10 : i32, message = "bqk,bkd->bqd"}> : () -> ()
    %cst_32 = arith.constant dense<0.000000e+00> : vector<2x8x8xf32>
    %104 = tpu.matmul %103, %92, %cst_32 {dimension_numbers = #tpu.dot_dimension_numbers<[2], [1], [1], [2], [0, 0, 0, 1, 1, 2], [0], [0]>} : vector<2x8x8xbf16>, vector<2x8x8xbf16>, vector<2x8x8xf32> -> vector<2x8x8xf32>
    "tpu.trace_stop"() : () -> ()
    %105 = tpu.concatenate %59, %74, %89, %104 in 2 : vector<2x8x8xf32>, vector<2x8x8xf32>, vector<2x8x8xf32>, vector<2x8x8xf32> -> vector<2x8x32xf32>
    %106 = vector.shape_cast %105 : vector<2x8x32xf32> to vector<16x32xf32>
    %107 = arith.truncf %106 : vector<16x32xf32> to vector<16x32xbf16>
    %c0_33 = arith.constant 0 : index
    %c0_34 = arith.constant 0 : index
    %c0_35 = arith.constant 0 : index
    %108 = vector.load %arg7[%c0_33, %c0_34, %c0_35] : memref<1x32x32xbf16, #tpu.memory_space<vmem>>, vector<1x32x32xbf16>
    %109 = vector.shape_cast %108 : vector<1x32x32xbf16> to vector<32x32xbf16>
    %cst_36 = arith.constant dense<0.000000e+00> : vector<16x32xf32>
    %110 = tpu.matmul %107, %109, %cst_36 {dimension_numbers = #tpu.dot_dimension_numbers<[1], [0], [0], [1], [0, 0, 1, 1], [], []>} : vector<16x32xbf16>, vector<32x32xbf16>, vector<16x32xf32> -> vector<16x32xf32>
    %111 = vector.broadcast %11 : vector<1x32xf32> to vector<16x32xf32>
    %112 = arith.addf %110, %111 : vector<16x32xf32>
    %113 = arith.addf %4, %112 : vector<16x32xf32>
    %cst_37 = arith.constant dense<0.000000e+00> : vector<16xf32>
    %114 = vector.multi_reduction <add>, %113, %cst_37 [1] : vector<16x32xf32> to vector<16xf32>
    %115 = vector.shape_cast %114 : vector<16xf32> to vector<16x1xf32>
    %cst_38 = arith.constant 3.200000e+01 : f32
    %116 = vector.broadcast %cst_38 : f32 to vector<16x1xf32>
    %117 = arith.divf %115, %116 : vector<16x1xf32>
    %118 = vector.broadcast %117 : vector<16x1xf32> to vector<16x32xf32>
    %119 = arith.subf %113, %118 : vector<16x32xf32>
    %120 = arith.mulf %119, %119 : vector<16x32xf32>
    %cst_39 = arith.constant dense<0.000000e+00> : vector<16xf32>
    %121 = vector.multi_reduction <add>, %120, %cst_39 [1] : vector<16x32xf32> to vector<16xf32>
    %122 = vector.shape_cast %121 : vector<16xf32> to vector<16x1xf32>
    %cst_40 = arith.constant 3.200000e+01 : f32
    %123 = vector.broadcast %cst_40 : f32 to vector<16x1xf32>
    %124 = arith.divf %122, %123 : vector<16x1xf32>
    %125 = vector.broadcast %117 : vector<16x1xf32> to vector<16x32xf32>
    %126 = arith.subf %113, %125 : vector<16x32xf32>
    %cst_41 = arith.constant 9.99999974E-6 : f32
    %127 = vector.broadcast %cst_41 : f32 to vector<16x1xf32>
    %128 = arith.addf %124, %127 : vector<16x1xf32>
    %129 = math.rsqrt %128 : vector<16x1xf32>
    %130 = vector.broadcast %129 : vector<16x1xf32> to vector<16x32xf32>
    %131 = arith.mulf %126, %130 : vector<16x32xf32>
    %132 = vector.broadcast %9 : vector<1x32xf32> to vector<16x32xf32>
    %133 = arith.mulf %131, %132 : vector<16x32xf32>
    %134 = vector.broadcast %10 : vector<1x32xf32> to vector<16x32xf32>
    %135 = arith.addf %133, %134 : vector<16x32xf32>
    %136 = arith.truncf %135 : vector<16x32xf32> to vector<16x32xbf16>
    %c0_42 = arith.constant 0 : index
    %c0_43 = arith.constant 0 : index
    %c0_44 = arith.constant 0 : index
    %137 = vector.load %arg8[%c0_42, %c0_43, %c0_44] : memref<1x32x64xbf16, #tpu.memory_space<vmem>>, vector<1x32x64xbf16>
    %138 = vector.shape_cast %137 : vector<1x32x64xbf16> to vector<32x64xbf16>
    %cst_45 = arith.constant dense<0.000000e+00> : vector<16x64xf32>
    %139 = tpu.matmul %136, %138, %cst_45 {dimension_numbers = #tpu.dot_dimension_numbers<[1], [0], [0], [1], [0, 0, 1, 1], [], []>} : vector<16x32xbf16>, vector<32x64xbf16>, vector<16x64xf32> -> vector<16x64xf32>
    %c0_46 = arith.constant 0 : index
    %c0_47 = arith.constant 0 : index
    %c0_48 = arith.constant 0 : index
    %140 = vector.load %arg5[%c0_46, %c0_47, %c0_48] : memref<1x1x64xf32, #tpu.memory_space<vmem>>, vector<1x1x64xf32>
    %141 = vector.shape_cast %140 : vector<1x1x64xf32> to vector<1x64xf32>
    %142 = vector.broadcast %141 : vector<1x64xf32> to vector<16x64xf32>
    %143 = arith.addf %139, %142 : vector<16x64xf32>
    %cst_49 = arith.constant 5.000000e-01 : f32
    %144 = vector.broadcast %cst_49 : f32 to vector<16x64xf32>
    %145 = arith.mulf %144, %143 : vector<16x64xf32>
    %146 = arith.mulf %143, %143 : vector<16x64xf32>
    %147 = arith.mulf %143, %146 : vector<16x64xf32>
    %cst_50 = arith.constant 4.471500e-02 : f32
    %148 = vector.broadcast %cst_50 : f32 to vector<16x64xf32>
    %149 = arith.mulf %148, %147 : vector<16x64xf32>
    %150 = arith.addf %143, %149 : vector<16x64xf32>
    %cst_51 = arith.constant 0.797884583 : f32
    %151 = vector.broadcast %cst_51 : f32 to vector<16x64xf32>
    %152 = arith.mulf %151, %150 : vector<16x64xf32>
    %153 = math.tanh %152 : vector<16x64xf32>
    %cst_52 = arith.constant 1.000000e+00 : f32
    %154 = vector.broadcast %cst_52 : f32 to vector<16x64xf32>
    %155 = arith.addf %154, %153 : vector<16x64xf32>
    %156 = arith.mulf %145, %155 : vector<16x64xf32>
    %157 = arith.truncf %156 : vector<16x64xf32> to vector<16x64xbf16>
    %c0_53 = arith.constant 0 : index
    %c0_54 = arith.constant 0 : index
    %c0_55 = arith.constant 0 : index
    %158 = vector.load %arg9[%c0_53, %c0_54, %c0_55] : memref<1x64x32xbf16, #tpu.memory_space<vmem>>, vector<1x64x32xbf16>
    %159 = vector.shape_cast %158 : vector<1x64x32xbf16> to vector<64x32xbf16>
    %cst_56 = arith.constant dense<0.000000e+00> : vector<16x32xf32>
    %160 = tpu.matmul %157, %159, %cst_56 {dimension_numbers = #tpu.dot_dimension_numbers<[1], [0], [0], [1], [0, 0, 1, 1], [], []>} : vector<16x64xbf16>, vector<64x32xbf16>, vector<16x32xf32> -> vector<16x32xf32>
    %161 = vector.broadcast %12 : vector<1x32xf32> to vector<16x32xf32>
    %162 = arith.addf %160, %161 : vector<16x32xf32>
    %163 = arith.addf %113, %162 : vector<16x32xf32>
    %164 = vector.shape_cast %163 : vector<16x32xf32> to vector<2x8x32xf32>
    %c0_57 = arith.constant 0 : index
    %c0_58 = arith.constant 0 : index
    %c0_59 = arith.constant 0 : index
    %165 = vector.load %arg10[%c0_57, %c0_58, %c0_59] : memref<2x8x32xf32, #tpu.memory_space<vmem>>, vector<2x8x32xf32>
    tpu.vector_store %arg10[%c0_57, %c0_58, %c0_59], %164 {strides = array<i32>} : memref<2x8x32xf32, #tpu.memory_space<vmem>>, vector<2x8x32xf32>,
    return
  }
  func.func @transform_0(%arg0: i32, %arg1: i32) -> (i32, i32, i32) {
    %c0_i32 = arith.constant 0 : i32
    %c0_i32_0 = arith.constant 0 : i32
    %c0_i32_1 = arith.constant 0 : i32
    return %arg0, %c0_i32, %c0_i32_0 : i32, i32, i32
  }
  func.func @transform_1(%arg0: i32, %arg1: i32) -> (i32, i32, i32) {
    %c0_i32 = arith.constant 0 : i32
    %c0_i32_0 = arith.constant 0 : i32
    %c0_i32_1 = arith.constant 0 : i32
    return %arg1, %c0_i32, %c0_i32_0 : i32, i32, i32
  }
  func.func @transform_2(%arg0: i32, %arg1: i32) -> (i32, i32, i32) {
    %c0_i32 = arith.constant 0 : i32
    %c0_i32_0 = arith.constant 0 : i32
    %c0_i32_1 = arith.constant 0 : i32
    return %arg1, %c0_i32, %c0_i32_0 : i32, i32, i32
  }
  func.func @transform_3(%arg0: i32, %arg1: i32) -> (i32, i32, i32) {
    %c0_i32 = arith.constant 0 : i32
    %c0_i32_0 = arith.constant 0 : i32
    %c0_i32_1 = arith.constant 0 : i32
    return %arg1, %c0_i32, %c0_i32_0 : i32, i32, i32
  }
  func.func @transform_4(%arg0: i32, %arg1: i32) -> (i32, i32, i32) {
    %c0_i32 = arith.constant 0 : i32
    %c0_i32_0 = arith.constant 0 : i32
    %c0_i32_1 = arith.constant 0 : i32
    return %arg1, %c0_i32, %c0_i32_0 : i32, i32, i32
  }
  func.func @transform_5(%arg0: i32, %arg1: i32) -> (i32, i32, i32) {
    %c0_i32 = arith.constant 0 : i32
    %c0_i32_0 = arith.constant 0 : i32
    %c0_i32_1 = arith.constant 0 : i32
    return %arg1, %c0_i32, %c0_i32_0 : i32, i32, i32
  }
  func.func @transform_6(%arg0: i32, %arg1: i32) -> (i32, i32, i32) {
    %c0_i32 = arith.constant 0 : i32
    %c0_i32_0 = arith.constant 0 : i32
    %c0_i32_1 = arith.constant 0 : i32
    return %arg1, %c0_i32, %c0_i32_0 : i32, i32, i32
  }
  func.func @transform_7(%arg0: i32, %arg1: i32) -> (i32, i32, i32) {
    %c0_i32 = arith.constant 0 : i32
    %c0_i32_0 = arith.constant 0 : i32
    %c0_i32_1 = arith.constant 0 : i32
    return %arg1, %c0_i32, %c0_i32_0 : i32, i32, i32
  }
  func.func @transform_8(%arg0: i32, %arg1: i32) -> (i32, i32, i32) {
    %c0_i32 = arith.constant 0 : i32
    %c0_i32_0 = arith.constant 0 : i32
    %c0_i32_1 = arith.constant 0 : i32
    return %arg0, %c0_i32, %c0_i32_0 : i32, i32, i32
  }
}

</mosaic_0001>

<bundles_post_ra>
// kernel: tpu_custom_call.1
= control target key start
LH: loop header
LB: loop body
LE: loop exit
PB: predicated region body
PF: predicated region fallthrough
CT: control target
= control target key end

     0   :  { %13 = vsyncpa [#allocation3], 0  ;;  %s2359_s27 = smov 0   ;;  %s2361_s28 = smov 0   ;;  %s2690_s0 = inlined_call_operand.vmem [shape: f32[2,8,32], index: 0, kind: input, shape index: {}]   ;;  %s2691_s1 = inlined_call_operand.vmem [shape: f32[2,6,32], index: 1, kind: input, shape index: {}]   ;;  %s2692_s2 = inlined_call_operand.vmem [shape: f32[2,1,96], index: 2, kind: input, shape index: {}]   ;;  %s2693_s3 = inlined_call_operand.vmem [shape: f32[2,1,64], index: 3, kind: input, shape index: {}]   ;;  %s2694_s4 = inlined_call_operand.vmem [shape: bf16[2,32,96], index: 4, kind: input, shape index: {}]   ;;  %s2695_s5 = inlined_call_operand.vmem [shape: bf16[2,32,32], index: 5, kind: input, shape index: {}]   ;;  %s2696_s6 = inlined_call_operand.vmem [shape: bf16[2,32,64], index: 6, kind: input, shape index: {}]   ;;  %s2697_s7 = inlined_call_operand.vmem [shape: bf16[2,64,32], index: 7, kind: input, shape index: {}]   ;;  %s2698_s8 = inlined_call_operand.hbm [shape: f32[2,8,32], index: 8, kind: output, shape index: {}]  }
   0x1   :  { %s2363_s29 = smov 0  }
   0x2 LB: > { %s28_s9 = sadd.s32 1, %s2290_s28  ;;  %p1896_p1 = scmp.ge.s32.totalorder %s2294_s29, 1  ;;  %s2294_s29 = sphi %s2363_s29, %s19_s29   ;;  %s2290_s28 = sphi %s2361_s28, %s2702_s28   ;;  %s2286_s27 = sphi %s2359_s27, %s2701_s27  }
   0x3   : > { %p29_p0 = scmp.ge.s32.totalorder %s28_s9, 2  ;;  %p341_p2 = scmp.lt.s32.totalorder %s2294_s29, 3 }
   0x5   : > { %s2704_s9 = smov (%p29_p0, %s28_s9), 0  ;;  %p342_p3 = pnand %p1896_p1, %p341_p2 }
   0x6   : > { %p406_p4 = scmp.lt.s32.totalorder (!%p342_p3), %s2286_s27, 1  ;;  %p1906_p5 = scmp.ne.s32.totalorder (!%p342_p3), %s2286_s27, 0 }
   0x7   : > { %345 = sbr.rel (%p342_p3) target bundleno = 4172 (0x104c), region = 52 }
   0xe   : > { %s2378_s10 = scalar_select %p406_p4, %s2286_s27, 1 }
   0xf   : > { %441 = sbr.rel (%p1906_p5) target bundleno = 22 (0x16), region = 56  ;;  %v442_v0 = vld [vmem:[%s2690_s0] sm:$0xff] (!%p1906_p5)  ;;  %vm444_vm0 = vcmask (!%p1906_p5), 261120   ;;  %v443_v1 = vld [vmem:[%s2690_s0 + $0x8] sm:$0xff] (!%p1906_p5) }
  0x10   : > { %s1897_s11 = sshll.u32 %s2378_s10, 3  ;;  %s412_s14 = scalar_lea.vmem %s2692_s2, %s2378_s10  ;;  %445 = vst.msk [vmem:[#allocation2] sm:$0xff] (!%p1906_p5), %vm444_vm0, %v442_v0  ;;  %446 = vst.msk [vmem:[#allocation2 + $0x8] sm:$0xff] (!%p1906_p5), %vm444_vm0, %v443_v1 }
  0x11   : > { %s2388_s17 = scalar_lea.vmem %s2691_s1, %s1897_s11  ;;  %s415_s20 = scalar_lea.vmem %s2693_s3, %s2378_s10 }
  0x12   : > { %s1943_s21 = sshll.u32 %s2378_s10, 4  ;;  %s1946_s22 = sshll.u32 %s2378_s10, 5 }
  0x13   : > { %s2399_s25 = scalar_lea.vmem %s2694_s4, %s1943_s21  ;;  %s2404_s12 = scalar_lea.vmem %s2695_s5, %s1943_s21 }
  0x14   : > { %s2409_s11 = scalar_lea.vmem %s2696_s6, %s1943_s21  ;;  %s2414_s19 = scalar_lea.vmem %s2697_s7, %s1946_s22 }
  0x16 PF: > { %vm450_vm1 = vcmask 261120   ;;  %v2188_v16 = vld [vmem:[%s2399_s25] sm:$0xff]   ;;  %v2296_v17 = vmov 0.0   ;;  %v2189_v18 = vld [vmem:[%s2399_s25 + $0x8] sm:$0xff]   ;;  %vm2297_vm2 = vmmov 0   ;;  %v478_v23 = vlaneseq  ;;  %s2298_s21 = smov 96  }
  0x17   : > { %v2422_v2 = vld [vmem:[#allocation2] sm:$0xff]  ;;  %v2424_v3 = vld [vmem:[#allocation2 + $0x8] sm:$0xff]  ;;  %1993 = vmatprep.subr.bf16.mxu0 %v2296_v17  ;;  %2001 = vmatprep.subr.bf16.mxu1 %v2296_v17  ;;  %vm563_vm3 = vcmask 64512   ;;  %s2300_s22 = smov 88   ;;  %vm688_vm4 = vcmask 1043456   ;;  %s2301_s25 = smov 120  }
  0x18   : > { %v451_v4 = vsel %vm450_vm1, %v2422_v2, 0.0  ;;  %v454_v5 = vsel %vm450_vm1, %v2424_v3, 0.0  ;;  %1994 = vmatpush3.bf16.msra.mxu0 %v2188_v16  ;;  %1997 = vmatprep.mubr.msk.bf16.mxu0 %vm2297_vm2, %v2296_v17  ;;  %v2444_v26 = vshrl.u32 %v478_v23, 7  ;;  %v2448_v28 = vld [vmem:[%s2388_s17] sm:$0x3f]  ;;  %s2302_s13 = smov 56  }
  0x19   : > { %452 = vadd.xlane.f32.xlu0 %v451_v4  ;;  %1995 = vmatprep.subr.bf16.mxu0 %v2296_v17  ;;  %v1907_v41 = vld [vmem:[%s412_s14] ss:$0 sm:$0xff]  ;;  %s2299_s14 = smov 64   ;;  %s2303_s15 = smov 80   ;;  %vm1466_vm5 = vcmask 130048   ;;  %vm1469_vm6 = vcmask 195584  }
  0x1a   : > { %2003 = vmatprep.mubr.msk.bf16.mxu1 %vm2297_vm2, %v2296_v17  ;;  %v480_v27 = vsub.s32 0, %v2444_v26  ;;  %v486_v32 = vsub.s32 1, %v2444_v26  ;;  %s2304_s16 = smov 112   ;;  %s2305_s18 = smov 48   ;;  %vm1700_vm7 = vcmask 523264  }
  0x1b   : > { %s2306_s23 = smov 72   ;;  %s2307_s24 = smov 104  }
  0x1c   : > { %1996 = vmatpush3.bf16.msra.mxu0 %v2189_v18  ;;  %v481_v31 = vrot.slane %v2448_v28, %v480_v27  ;;  %v487_v36 = vrot.slane %v2448_v28, %v486_v32  ;;  %s2308_s30 = smov 40   ;;  %s2309_s26 = smov 8  }
  0x1d   : > { %455 = vadd.xlane.f32.xlu0 %v454_v5  ;;  %2007 = vmatprep.subr.bf16.mxu0 %v2296_v17  ;;  %s2310_s27 = smov 16   ;;  %s2311_s17 = smov 24  }
  0x1e   : > { %s2312_s10 = smov [#allocation2]  }
  0xa6   : > { %v453_v6 = vpop.xlane.xlu0 %452 }
  0xa7   : > { %v458_v7 = vmul.f32 0.03125, %v453_v6 }
  0xa9   : > { %v460_v8 = vsub.f32 %v2422_v2, %v458_v7 }
  0xaa   : > { %v456_v9 = vpop.xlane.xlu0 %455 }
  0xab   : > { %v459_v10 = vmul.f32 0.03125, %v456_v9  ;;  %v462_v11 = vmul.f32 %v460_v8, %v460_v8 }
  0xad   : > { %v461_v12 = vsub.f32 %v2424_v3, %v459_v10  ;;  %v464_v13 = vsel %vm450_vm1, %v462_v11, 0.0 }
  0xae   : > { %465 = vadd.xlane.f32.xlu1 %v464_v13 }
  0xaf   : > { %v463_v14 = vmul.f32 %v461_v12, %v461_v12 }
  0xb1   : > { %v467_v15 = vsel %vm450_vm1, %v463_v14, 0.0 }
  0xb2   : > { %468 = vadd.xlane.f32.xlu1 %v467_v15 }
 0x13b   : > { %v466_v19 = vpop.xlane.xlu1 %465 }
 0x13c   : > { %v470_v20 = vmul.f32 0.03125, %v466_v19 }
 0x13e   : > { %v472_v21 = vadd.f32 1e-05, %v470_v20 }
 0x13f   : > { %v469_v22 = vpop.xlane.xlu1 %468 }
 0x140   : > { %2198 = vrsqrt.f32 %v472_v21  ;;  %v471_v24 = vmul.f32 0.03125, %v469_v22 }
 0x142   : > { %v473_v25 = vadd.f32 1e-05, %v471_v24 }
 0x144   : > { %2200 = vrsqrt.f32 %v473_v25 }
 0x14a   : > { %v2199_v29 = vpop.eup %2198 }
 0x14b   : > { %v476_v30 = vmul.f32 %v2199_v29, %v460_v8 }
 0x14d   : > { %v482_v35 = vmul.f32 %v481_v31, %v476_v30 }
 0x14e   : > { %v2201_v33 = vpop.eup %2200 }
 0x14f   : > { %v477_v34 = vmul.f32 %v2201_v33, %v461_v12  ;;  %v488_v38 = vadd.f32 %v487_v36, %v482_v35 }
 0x151   : > { %v483_v37 = vmul.f32 %v481_v31, %v477_v34 }
 0x153   : > { %v489_v39 = vadd.f32 %v487_v36, %v483_v37 }
 0x155   : > { %v490_v40 = vpack.c.bf16 %v489_v39, %v488_v38 }
 0x157   : > { %1998 = vmatmul.mubr.msk.bf16.vlgmr.msra.gmra.mrb[0].mxu0 %vm450_vm1, %v490_v40 }
 0x158   : > { %2009 = vmatprep.mubr.msk.bf16.mxu0 %vm2297_vm2, %v2296_v17 }
 0x22a   : > { %v551_v42 = vpop.f32.mrb[0].mxu0 }
 0x22b   : > { %v552_v43 = vadd.f32 %v1907_v41, %v551_v42  ;;  %v1999_v44 = vpop.f32.mrb[1].mxu0 }
 0x22c   : > { %v554_v45 = vpop.f32.mrb[2].mxu0 }
 0x22d   : > { %v2461_v46 = vpack.c.bf16 %v552_v43, %v552_v43  ;;  %v555_v47 = vadd.f32 %v1907_v41, %v554_v45  ;;  %v2000_v48 = vpop.f32.mrb[3].mxu0 }
 0x22f   : > { %v2463_v49 = vpack.c.bf16 %v555_v47, %v555_v47  ;;  %561 = vrot.lane.b32.xlu0 %v2461_v46, %s2298_s21 }
 0x231   : > { %611 = vrot.lane.b32.xlu1 %v2463_v49, %s2298_s21 }
 0x2a1   : > { %v562_v50 = vpop.permute.xlu0 %561 }
 0x2a2   : > { %v568_v51 = vsel %vm563_vm3, %v562_v50, 0 }
 0x2a3   : > { %2002 = vmatpush3.bf16.xpose.msra.mxu1 %v568_v51  ;;  %v612_v52 = vpop.permute.xlu1 %611 }
 0x2a4   : > { %v617_v53 = vsel %vm563_vm3, %v612_v52, 0  ;;  %2013 = vmatprep.subr.bf16.mxu1 %v2296_v17 }
 0x2a5   : > { %2008 = vmatpush3.bf16.xpose.msra.mxu0 %v617_v53 }
 0x2a6   : > { %2019 = vmatprep.subr.bf16.mxu0 %v2296_v17 }
 0x2aa   : > { %2004 = vmatmul.mubr.msk.bf16.vlgmr.msra.gmra.mrb[0].mxu1 %vm563_vm3, %v2461_v46 }
 0x2ab   : > { %2015 = vmatprep.mubr.msk.bf16.mxu1 %vm2297_vm2, %v2296_v17 }
 0x2ac   : > { %2010 = vmatmul.mubr.msk.bf16.vlgmr.msra.gmra.mrb[4].mxu0 %vm563_vm3, %v2463_v49 }
 0x2ad   : > { %2021 = vmatprep.mubr.msk.bf16.mxu0 %vm2297_vm2, %v2296_v17 }
 0x37d   : > { %v604_v54 = vpop.f32.mrb[0].mxu1 }
 0x37e   : > { %v2005_v55 = vpop.f32.mrb[1].mxu1  ;;  %v659_v56 = vsel %vm563_vm3, %v604_v54, -inf }
 0x37f   : > { %v607_v57 = vpop.f32.mrb[2].mxu1  ;;  %660 = vmax.xlane.f32.xlu1 %v659_v56  ;;  %v653_v58 = vpop.f32.mrb[4].mxu0 }
 0x380   : > { %v2006_v59 = vpop.f32.mrb[3].mxu1  ;;  %v2011_v60 = vpop.f32.mrb[5].mxu0  ;;  %v662_v61 = vsel %vm563_vm3, %v653_v58, -inf }
 0x381   : > { %663 = vmax.xlane.f32.xlu0 %v662_v61  ;;  %v656_v62 = vpop.f32.mrb[6].mxu0 }
 0x382   : > { %v2012_v63 = vpop.f32.mrb[7].mxu0 }
 0x390   : > { %732 = vrot.lane.b32.xlu1 %v2463_v49, %s2299_s14 }
 0x394   : > { %782 = vrot.lane.b32.xlu1 %v2461_v46, %s2300_s22 }
 0x40c   : > { %v661_v0 = vpop.xlane.xlu1 %660 }
 0x40d   : > { %v665_v1 = vsub.f32 %v604_v54, %v661_v0 }
 0x40e   : > { %v664_v4 = vpop.xlane.xlu0 %663 }
 0x40f   : > { %v667_v5 = vmul.f32 1.442695, %v665_v1  ;;  %v666_v6 = vsub.f32 %v653_v58, %v664_v4 }
 0x410   : > { %v733_v7 = vpop.permute.xlu1 %732 }
 0x411   : > { %2202 = vpow2.f32 %v667_v5  ;;  %v669_v8 = vmul.f32 1.442695, %v666_v6  ;;  %v738_v9 = vsel %vm688_vm4, %v733_v7, 0 }
 0x412   : > { %2020 = vmatpush3.bf16.msra.mxu0 %v738_v9 }
 0x413   : > { %2204 = vpow2.f32 %v669_v8  ;;  %2031 = vmatprep.subr.bf16.mxu0 %v2296_v17 }
 0x414   : > { %v783_v14 = vpop.permute.xlu1 %782 }
 0x415   : > { %v788_v27 = vsel %vm563_vm3, %v783_v14, 0 }
 0x41b   : > { %v2203_v10 = vpop.eup %2202 }
 0x41c   : > { %v671_v11 = vsel %vm563_vm3, %v2203_v10, 0.0 }
 0x41d   : > { %v2205_v12 = vpop.eup %2204  ;;  %672 = vadd.xlane.f32.xlu0 %v671_v11 }
 0x41e   : > { %v674_v13 = vsel %vm563_vm3, %v2205_v12, 0.0 }
 0x41f   : > { %675 = vadd.xlane.f32.xlu1 %v674_v13 }
 0x430   : > { %832 = vrot.lane.b32.xlu1 %v2463_v49, %s2300_s22 }
 0x433   : > { %683 = vrot.lane.b32.xlu0 %v2461_v46, %s2299_s14 }
 0x434   : > { %830 = vrot.lane.b32.xlu1 %v2463_v49, %s2301_s25 }
 0x437   : > { %780 = vrot.lane.b32.xlu0 %v2461_v46, %s2301_s25 }
 0x4aa   : > { %v673_v15 = vpop.xlane.xlu0 %672 }
 0x4ab   : > { %2206 = vrcp.f32 %v673_v15 }
 0x4ac   : > { %v676_v16 = vpop.xlane.xlu1 %675 }
 0x4ad   : > { %2208 = vrcp.f32 %v676_v16 }
 0x4ae   : > { %v684_v18 = vpop.permute.xlu0 %683 }
 0x4af   : > { %v690_v19 = vsel %vm688_vm4, %v684_v18, 0 }
 0x4b0   : > { %2014 = vmatpush3.bf16.msra.mxu1 %v690_v19  ;;  %v833_v25 = vpop.permute.xlu1 %832 }
 0x4b1   : > { %2025 = vmatprep.subr.bf16.mxu1 %v2296_v17  ;;  %v838_v30 = vsel %vm563_vm3, %v833_v25, 0 }
 0x4b2   : > { %v781_v31 = vpop.permute.xlu0 %780 }
 0x4b4   : > { %v831_v32 = vpop.permute.xlu1 %830 }
 0x4b5   : > { %v2207_v20 = vpop.eup %2206 }
 0x4b6   : > { %v678_v21 = vmul.f32 %v2207_v20, %v2203_v10 }
 0x4b7   : > { %v2209_v22 = vpop.eup %2208 }
 0x4b8   : > { %v680_v23 = vmul.f32 %v2209_v22, %v2205_v12  ;;  %v681_v24 = vpack.c.bf16 %v678_v21, %v678_v21 }
 0x4ba   : > { %2016 = vmatmul.mubr.msk.bf16.vlgmr.msra.gmra.mrb[4].mxu1 %vm563_vm3, %v681_v24  ;;  %v682_v29 = vpack.c.bf16 %v680_v23, %v680_v23 }
 0x4bb   : > { %2026 = vmatpush3.bf16.xpose.msra.mxu1 %v788_v27  ;;  %2027 = vmatprep.mubr.msk.bf16.mxu1 %vm2297_vm2, %v2296_v17 }
 0x4bc   : > { %2022 = vmatmul.mubr.msk.bf16.vlgmr.msra.gmra.mrb[8].mxu0 %vm563_vm3, %v682_v29  ;;  %2037 = vmatprep.subr.bf16.mxu1 %v2296_v17 }
 0x4bd   : > { %2032 = vmatpush3.bf16.xpose.msra.mxu0 %v838_v30  ;;  %2033 = vmatprep.mubr.msk.bf16.mxu0 %vm2297_vm2, %v2296_v17 }
 0x4be   : > { %2043 = vmatprep.subr.bf16.mxu0 %v2296_v17 }
 0x4c2   : > { %2028 = vmatmul.mubr.msk.bf16.vlgmr.msra.gmra.mrb[8].mxu1 %vm563_vm3, %v781_v31 }
 0x4c3   : > { %2039 = vmatprep.mubr.msk.bf16.mxu1 %vm2297_vm2, %v2296_v17 }
 0x4c4   : > { %2034 = vmatmul.mubr.msk.bf16.vlgmr.msra.gmra.mrb[12].mxu0 %vm563_vm3, %v831_v32 }
 0x4c5   : > { %2045 = vmatprep.mubr.msk.bf16.mxu0 %vm2297_vm2, %v2296_v17 }
 0x58d   : > { %v2509_v33 = vpop.f32.mrb[4].mxu1 }
 0x58e   : > { %v2017_v34 = vpop.f32.mrb[5].mxu1 }
 0x58f   : > { %v729_v35 = vpop.f32.mrb[6].mxu1  ;;  %v2511_v36 = vpop.f32.mrb[8].mxu0 }
 0x590   : > { %v2018_v37 = vpop.f32.mrb[7].mxu1  ;;  %v2023_v38 = vpop.f32.mrb[9].mxu0 }
 0x591   : > { %v777_v39 = vpop.f32.mrb[10].mxu0 }
 0x592   : > { %v2024_v40 = vpop.f32.mrb[11].mxu0 }
 0x595   : > { %v824_v41 = vpop.f32.mrb[8].mxu1 }
 0x596   : > { %v2029_v42 = vpop.f32.mrb[9].mxu1  ;;  %v880_v43 = vsel %vm563_vm3, %v824_v41, -inf }
 0x597   : > { %881 = vmax.xlane.f32.xlu0 %v880_v43  ;;  %v827_v44 = vpop.f32.mrb[10].mxu1  ;;  %v874_v45 = vpop.f32.mrb[12].mxu0 }
 0x598   : > { %v2030_v47 = vpop.f32.mrb[11].mxu1  ;;  %v2035_v48 = vpop.f32.mrb[13].mxu0  ;;  %v883_v50 = vsel %vm563_vm3, %v874_v45, -inf }
 0x599   : > { %884 = vmax.xlane.f32.xlu1 %v883_v50  ;;  %v877_v51 = vpop.f32.mrb[14].mxu0 }
 0x59a   : > { %v2036_v52 = vpop.f32.mrb[15].mxu0 }
 0x5aa   : > { %952 = vrot.lane.b32.xlu1 %v2463_v49, %s2302_s13 }
 0x5ae   : > { %1002 = vrot.lane.b32.xlu1 %v2461_v46, %s2303_s15 }
 0x5b2   : > { %1052 = vrot.lane.b32.xlu1 %v2463_v49, %s2303_s15 }
 0x5b6   : > { %1050 = vrot.lane.b32.xlu1 %v2463_v49, %s2304_s16 }
 0x624   : > { %v882_v53 = vpop.xlane.xlu0 %881 }
 0x625   : > { %v886_v54 = vsub.f32 %v824_v41, %v882_v53 }
 0x626   : > { %v885_v55 = vpop.xlane.xlu1 %884 }
 0x627   : > { %v888_v56 = vmul.f32 1.442695, %v886_v54  ;;  %v887_v57 = vsub.f32 %v874_v45, %v885_v55 }
 0x629   : > { %2210 = vpow2.f32 %v888_v56  ;;  %v890_v58 = vmul.f32 1.442695, %v887_v57 }
 0x62a   : > { %v953_v59 = vpop.permute.xlu1 %952 }
 0x62b   : > { %2212 = vpow2.f32 %v890_v58  ;;  %v958_v60 = vsel %vm688_vm4, %v953_v59, 0 }
 0x62c   : > { %2044 = vmatpush3.bf16.msra.mxu0 %v958_v60 }
 0x62d   : > { %2055 = vmatprep.subr.bf16.mxu0 %v2296_v17 }
 0x62e   : > { %v1003_v8 = vpop.permute.xlu1 %1002 }
 0x62f   : > { %v1008_v14 = vsel %vm563_vm3, %v1003_v8, 0 }
 0x632   : > { %v1053_v13 = vpop.permute.xlu1 %1052 }
 0x633   : > { %v2211_v61 = vpop.eup %2210  ;;  %v1058_v16 = vsel %vm563_vm3, %v1053_v13, 0 }
 0x634   : > { %v892_v62 = vsel %vm563_vm3, %v2211_v61, 0.0 }
 0x635   : > { %v2213_v63 = vpop.eup %2212  ;;  %893 = vadd.xlane.f32.xlu0 %v892_v62 }
 0x636   : > { %v895_v0 = vsel %vm563_vm3, %v2213_v63, 0.0  ;;  %v1051_v19 = vpop.permute.xlu1 %1050 }
 0x639   : > { %896 = vadd.xlane.f32.xlu0 %v895_v0 }
 0x64f   : > { %904 = vrot.lane.b32.xlu0 %v2461_v46, %s2302_s13 }
 0x653   : > { %1000 = vrot.lane.b32.xlu0 %v2461_v46, %s2304_s16 }
 0x6c2   : > { %v894_v1 = vpop.xlane.xlu0 %893 }
 0x6c3   : > { %2214 = vrcp.f32 %v894_v1 }
 0x6c6   : > { %v897_v4 = vpop.xlane.xlu0 %896 }
 0x6c7   : > { %2216 = vrcp.f32 %v897_v4 }
 0x6ca   : > { %v905_v5 = vpop.permute.xlu0 %904 }
 0x6cb   : > { %v910_v6 = vsel %vm688_vm4, %v905_v5, 0 }
 0x6cc   : > { %2038 = vmatpush3.bf16.msra.mxu1 %v910_v6 }
 0x6cd   : > { %v2215_v7 = vpop.eup %2214  ;;  %2049 = vmatprep.subr.bf16.mxu1 %v2296_v17 }
 0x6ce   : > { %v899_v9 = vmul.f32 %v2215_v7, %v2211_v61  ;;  %v1001_v18 = vpop.permute.xlu0 %1000 }
 0x6d0   : > { %v902_v10 = vpack.c.bf16 %v899_v9, %v899_v9 }
 0x6d1   : > { %v2217_v11 = vpop.eup %2216 }
 0x6d2   : > { %v901_v12 = vmul.f32 %v2217_v11, %v2213_v63  ;;  %2040 = vmatmul.mubr.msk.bf16.vlgmr.msra.gmra.mrb[12].mxu1 %vm563_vm3, %v902_v10 }
 0x6d3   : > { %2051 = vmatprep.mubr.msk.bf16.mxu1 %vm2297_vm2, %v2296_v17 }
 0x6d4   : > { %v903_v15 = vpack.c.bf16 %v901_v12, %v901_v12 }
 0x6d5   : > { %2050 = vmatpush3.bf16.xpose.msra.mxu1 %v1008_v14 }
 0x6d6   : > { %2046 = vmatmul.mubr.msk.bf16.vlgmr.msra.gmra.mrb[16].mxu0 %vm563_vm3, %v903_v15  ;;  %2061 = vmatprep.subr.bf16.mxu1 %v2296_v17 }
 0x6d7   : > { %2056 = vmatpush3.bf16.xpose.msra.mxu0 %v1058_v16  ;;  %2057 = vmatprep.mubr.msk.bf16.mxu0 %vm2297_vm2, %v2296_v17 }
 0x6d8   : > { %2067 = vmatprep.subr.bf16.mxu0 %v2296_v17 }
 0x6dc   : > { %2052 = vmatmul.mubr.msk.bf16.vlgmr.msra.gmra.mrb[16].mxu1 %vm563_vm3, %v1001_v18 }
 0x6dd   : > { %2063 = vmatprep.mubr.msk.bf16.mxu1 %vm2297_vm2, %v2296_v17 }
 0x6de   : > { %2058 = vmatmul.mubr.msk.bf16.vlgmr.msra.gmra.mrb[20].mxu0 %vm563_vm3, %v1051_v19 }
 0x6df   : > { %2069 = vmatprep.mubr.msk.bf16.mxu0 %vm2297_vm2, %v2296_v17 }
 0x7a5   : > { %v2543_v20 = vpop.f32.mrb[12].mxu1 }
 0x7a6   : > { %v2041_v21 = vpop.f32.mrb[13].mxu1 }
 0x7a7   : > { %v949_v22 = vpop.f32.mrb[14].mxu1 }
 0x7a8   : > { %v2042_v23 = vpop.f32.mrb[15].mxu1 }
 0x7a9   : > { %v2545_v24 = vpop.f32.mrb[16].mxu0 }
 0x7aa   : > { %v2173_v25 = vpack.i.bf16 %v2545_v24, %v2543_v20  ;;  %v2047_v27 = vpop.f32.mrb[17].mxu0 }
 0x7ab   : > { %v997_v29 = vpop.f32.mrb[18].mxu0 }
 0x7ac   : > { %v2048_v30 = vpop.f32.mrb[19].mxu0 }
 0x7af   : > { %v1044_v31 = vpop.f32.mrb[16].mxu1 }
 0x7b0   : > { %v2053_v32 = vpop.f32.mrb[17].mxu1  ;;  %v1100_v34 = vsel %vm563_vm3, %v1044_v31, -inf }
 0x7b1   : > { %1101 = vmax.xlane.f32.xlu0 %v1100_v34  ;;  %v1047_v35 = vpop.f32.mrb[18].mxu1  ;;  %v1094_v37 = vpop.f32.mrb[20].mxu0 }
 0x7b2   : > { %v2054_v38 = vpop.f32.mrb[19].mxu1  ;;  %v2059_v39 = vpop.f32.mrb[21].mxu0  ;;  %v1103_v40 = vsel %vm563_vm3, %v1094_v37, -inf }
 0x7b3   : > { %1104 = vmax.xlane.f32.xlu1 %v1103_v40  ;;  %v1097_v41 = vpop.f32.mrb[22].mxu0 }
 0x7b4   : > { %v2060_v42 = vpop.f32.mrb[23].mxu0 }
 0x7c4   : > { %1172 = vrot.lane.b32.xlu1 %v2463_v49, %s2305_s18 }
 0x7c8   : > { %1222 = vrot.lane.b32.xlu1 %v2461_v46, %s2306_s23 }
 0x7cc   : > { %1272 = vrot.lane.b32.xlu1 %v2463_v49, %s2306_s23 }
 0x7d0   : > { %1270 = vrot.lane.b32.xlu1 %v2463_v49, %s2307_s24 }
 0x83e   : > { %v1102_v43 = vpop.xlane.xlu0 %1101 }
 0x83f   : > { %v1106_v44 = vsub.f32 %v1044_v31, %v1102_v43 }
 0x840   : > { %v1105_v45 = vpop.xlane.xlu1 %1104 }
 0x841   : > { %v1108_v47 = vmul.f32 1.442695, %v1106_v44  ;;  %v1107_v48 = vsub.f32 %v1094_v37, %v1105_v45 }
 0x843   : > { %2218 = vpow2.f32 %v1108_v47  ;;  %v1110_v50 = vmul.f32 1.442695, %v1107_v48 }
 0x844   : > { %v1173_v51 = vpop.permute.xlu1 %1172 }
 0x845   : > { %2220 = vpow2.f32 %v1110_v50  ;;  %v1178_v52 = vsel %vm688_vm4, %v1173_v51, 0 }
 0x846   : > { %2068 = vmatpush3.bf16.msra.mxu0 %v1178_v52 }
 0x847   : > { %2079 = vmatprep.subr.bf16.mxu0 %v2296_v17 }
 0x848   : > { %v1223_v62 = vpop.permute.xlu1 %1222 }
 0x849   : > { %v1228_v6 = vsel %vm563_vm3, %v1223_v62, 0 }
 0x84c   : > { %v1273_v5 = vpop.permute.xlu1 %1272 }
 0x84d   : > { %v2219_v53 = vpop.eup %2218  ;;  %v1278_v8 = vsel %vm563_vm3, %v1273_v5, 0 }
 0x84e   : > { %v1112_v54 = vsel %vm563_vm3, %v2219_v53, 0.0 }
 0x84f   : > { %v2221_v55 = vpop.eup %2220  ;;  %1113 = vadd.xlane.f32.xlu0 %v1112_v54 }
 0x850   : > { %v1115_v56 = vsel %vm563_vm3, %v2221_v55, 0.0  ;;  %v1271_v10 = vpop.permute.xlu1 %1270 }
 0x853   : > { %1116 = vadd.xlane.f32.xlu0 %v1115_v56 }
 0x869   : > { %1124 = vrot.lane.b32.xlu0 %v2461_v46, %s2305_s18 }
 0x86d   : > { %1220 = vrot.lane.b32.xlu0 %v2461_v46, %s2307_s24 }
 0x8dc   : > { %v1114_v57 = vpop.xlane.xlu0 %1113 }
 0x8dd   : > { %2222 = vrcp.f32 %v1114_v57  ;;  %v2190_v57 = vld [vmem:[%s2404_s12] sm:$0xff]  }
 0x8e0   : > { %v1117_v58 = vpop.xlane.xlu0 %1116 }
 0x8e1   : > { %2224 = vrcp.f32 %v1117_v58  ;;  %v2191_v58 = vld [vmem:[%s2404_s12 + $0x8] sm:$0xff]  }
 0x8e4   : > { %v1125_v59 = vpop.permute.xlu0 %1124 }
 0x8e5   : > { %v1130_v60 = vsel %vm688_vm4, %v1125_v59, 0 }
 0x8e6   : > { %2062 = vmatpush3.bf16.msra.mxu1 %v1130_v60 }
 0x8e7   : > { %v2223_v61 = vpop.eup %2222  ;;  %2073 = vmatprep.subr.bf16.mxu1 %v2296_v17 }
 0x8e8   : > { %v1119_v63 = vmul.f32 %v2223_v61, %v2219_v53  ;;  %v1221_v9 = vpop.permute.xlu0 %1220 }
 0x8ea   : > { %v1122_v0 = vpack.c.bf16 %v1119_v63, %v1119_v63 }
 0x8eb   : > { %v2225_v1 = vpop.eup %2224 }
 0x8ec   : > { %v1121_v4 = vmul.f32 %v2225_v1, %v2221_v55  ;;  %2064 = vmatmul.mubr.msk.bf16.vlgmr.msra.gmra.mrb[20].mxu1 %vm563_vm3, %v1122_v0 }
 0x8ed   : > { %2075 = vmatprep.mubr.msk.bf16.mxu1 %vm2297_vm2, %v2296_v17 }
 0x8ee   : > { %v1123_v7 = vpack.c.bf16 %v1121_v4, %v1121_v4 }
 0x8ef   : > { %2074 = vmatpush3.bf16.xpose.msra.mxu1 %v1228_v6 }
 0x8f0   : > { %2070 = vmatmul.mubr.msk.bf16.vlgmr.msra.gmra.mrb[24].mxu0 %vm563_vm3, %v1123_v7  ;;  %2085 = vmatprep.subr.bf16.mxu1 %v2296_v17 }
 0x8f1   : > { %2080 = vmatpush3.bf16.xpose.msra.mxu0 %v1278_v8  ;;  %2081 = vmatprep.mubr.msk.bf16.mxu0 %vm2297_vm2, %v2296_v17 }
 0x8f2   : > { %2091 = vmatprep.subr.bf16.mxu0 %v2296_v17 }
 0x8f6   : > { %2076 = vmatmul.mubr.msk.bf16.vlgmr.msra.gmra.mrb[24].mxu1 %vm563_vm3, %v1221_v9 }
 0x8f7   : > { %2087 = vmatprep.mubr.msk.bf16.mxu1 %vm2297_vm2, %v2296_v17 }
 0x8f8   : > { %2082 = vmatmul.mubr.msk.bf16.vlgmr.msra.gmra.mrb[28].mxu0 %vm563_vm3, %v1271_v10 }
 0x8f9   : > { %2093 = vmatprep.mubr.msk.bf16.mxu0 %vm2297_vm2, %v2296_v17 }
 0x9bf   : > { %v1166_v11 = vpop.f32.mrb[20].mxu1 }
 0x9c0   : > { %v2065_v12 = vpop.f32.mrb[21].mxu1 }
 0x9c1   : > { %v1169_v13 = vpop.f32.mrb[22].mxu1 }
 0x9c2   : > { %v2066_v14 = vpop.f32.mrb[23].mxu1 }
 0x9c3   : > { %v1214_v15 = vpop.f32.mrb[24].mxu0 }
 0x9c4   : > { %v2178_v16 = vpack.i.bf16 %v1214_v15, %v1166_v11  ;;  %v2071_v18 = vpop.f32.mrb[25].mxu0 }
 0x9c5   : > { %v1217_v19 = vpop.f32.mrb[26].mxu0 }
 0x9c6   : > { %v2072_v21 = vpop.f32.mrb[27].mxu0 }
 0x9c9   : > { %v1264_v22 = vpop.f32.mrb[24].mxu1 }
 0x9ca   : > { %v2077_v23 = vpop.f32.mrb[25].mxu1  ;;  %v1320_v27 = vsel %vm563_vm3, %v1264_v22, -inf }
 0x9cb   : > { %1321 = vmax.xlane.f32.xlu0 %v1320_v27  ;;  %v1267_v29 = vpop.f32.mrb[26].mxu1  ;;  %v1314_v30 = vpop.f32.mrb[28].mxu0  ;;  %v1479_v27 = vsub.s32 4, %v2444_v26 }
 0x9cc   : > { %v2078_v31 = vpop.f32.mrb[27].mxu1  ;;  %v2083_v32 = vpop.f32.mrb[29].mxu0  ;;  %v1323_v34 = vsel %vm563_vm3, %v1314_v30, -inf }
 0x9cd   : > { %1324 = vmax.xlane.f32.xlu1 %v1323_v34  ;;  %v1317_v35 = vpop.f32.mrb[30].mxu0  ;;  %v1480_v29 = vrot.slane %v2448_v28, %v1479_v27 }
 0x9ce   : > { %v2084_v37 = vpop.f32.mrb[31].mxu0 }
 0x9de   : > { %1392 = vrot.lane.b32.xlu1 %v2463_v49, %s2308_s30 }
 0x9e2   : > { %2174 = vrot.lane.b32.xlu1 %v2173_v25, %s2309_s26 }
 0x9e6   : > { %2179 = vrot.lane.b32.xlu1 %v2178_v16, %s2310_s27 }
 0xa58   : > { %v1322_v38 = vpop.xlane.xlu0 %1321 }
 0xa59   : > { %v1326_v39 = vsub.f32 %v1264_v22, %v1322_v38 }
 0xa5a   : > { %v1325_v40 = vpop.xlane.xlu1 %1324 }
 0xa5b   : > { %v1328_v41 = vmul.f32 1.442695, %v1326_v39  ;;  %v1327_v42 = vsub.f32 %v1314_v30, %v1325_v40 }
 0xa5d   : > { %2226 = vpow2.f32 %v1328_v41  ;;  %v1330_v43 = vmul.f32 1.442695, %v1327_v42 }
 0xa5e   : > { %v1393_v44 = vpop.permute.xlu1 %1392 }
 0xa5f   : > { %2228 = vpow2.f32 %v1330_v43  ;;  %v1398_v45 = vsel %vm688_vm4, %v1393_v44, 0 }
 0xa60   : > { %2092 = vmatpush3.bf16.msra.mxu0 %v1398_v45 }
 0xa61   : > { %2105 = vmatprep.subr.bf16.mxu0 %v2296_v17 }
 0xa62   : > { %v2175_v6 = vpop.permute.xlu1 %2174 }
 0xa63   : > { %v2177_v8 = vunpack.i.h.bf16 %v2175_v6  ;;  %v2176_v9 = vunpack.i.l.bf16 %v2175_v6  ;;  %v2196_v6 = vld [vmem:[%s2414_s19 + $0x10] sm:$0xff]  }
 0xa65   : > { %v1465_v13 = vsel %vm563_vm3, %v2511_v36, %v2177_v8  ;;  %v1464_v14 = vsel %vm563_vm3, %v2509_v33, %v2176_v9  ;;  %v1930_v8 = vld [vmem:[%s415_s20] ss:$0 sm:$0xff]  ;;  %s1758_s20 = sshll.u32 %s2312_s10, 4  ;;  %s1759_s20 = int_to_ptr.vmem [resolvable:$true] %s1758_s20 }
 0xa66   : > { %v2180_v7 = vpop.permute.xlu1 %2179  ;;  %s2242_s14 = scalar_lea.vmem %s1759_s20, 256  ;;  %p2249_p10 = scmp.lt.s32.totalorder %s1759_s20, %s1759_s20 }
 0xa67   : > { %v2227_v49 = vpop.eup %2226  ;;  %v2182_v10 = vunpack.i.h.bf16 %v2180_v7  ;;  %v2181_v11 = vunpack.i.l.bf16 %v2180_v7  ;;  %v2197_v7 = vld [vmem:[%s2414_s19 + $0x18] sm:$0xff]   ;;  %p2243_p7 = scmp.ne.s32.totalorder %s1759_s20, %s2242_s14  ;;  %p2250_p11 = scmp.lt.s32.totalorder %s2242_s14, %s2242_s14 }
 0xa68   : > { %v1332_v20 = vsel %vm563_vm3, %v2227_v49, 0.0 }
 0xa69   : > { %v2229_v24 = vpop.eup %2228  ;;  %1333 = vadd.xlane.f32.xlu0 %v1332_v20  ;;  %v1467_v18 = vsel %vm1466_vm5, %v1464_v14, %v2181_v11  ;;  %v1468_v19 = vsel %vm1466_vm5, %v1465_v13, %v2182_v10  ;;  %p2251_p12 = por %p2250_p11, %p2249_p10 }
 0xa6a   : > { %v1335_v25 = vsel %vm563_vm3, %v2229_v24, 0.0 }
 0xa6d   : > { %1336 = vadd.xlane.f32.xlu0 %v1335_v25  ;;  %v2193_v25 = vld [vmem:[%s2409_s11 + $0x8] sm:$0xff]  }
 0xa83   : > { %1344 = vrot.lane.b32.xlu0 %v2461_v46, %s2308_s30 }
 0xaf6   : > { %v1334_v47 = vpop.xlane.xlu0 %1333 }
 0xaf7   : > { %2230 = vrcp.f32 %v1334_v47 }
 0xafa   : > { %v1337_v48 = vpop.xlane.xlu0 %1336 }
 0xafb   : > { %2232 = vrcp.f32 %v1337_v48 }
 0xafe   : > { %v1345_v50 = vpop.permute.xlu0 %1344 }
 0xaff   : > { %v1350_v51 = vsel %vm688_vm4, %v1345_v50, 0 }
 0xb00   : > { %2086 = vmatpush3.bf16.msra.mxu1 %v1350_v51 }
 0xb01   : > { %v2231_v52 = vpop.eup %2230  ;;  %2097 = vmatprep.subr.bf16.mxu1 %v2296_v17 }
 0xb02   : > { %v1339_v53 = vmul.f32 %v2231_v52, %v2227_v49 }
 0xb04   : > { %v1342_v54 = vpack.c.bf16 %v1339_v53, %v1339_v53 }
 0xb05   : > { %v2233_v55 = vpop.eup %2232 }
 0xb06   : > { %v1341_v56 = vmul.f32 %v2233_v55, %v2229_v24  ;;  %2088 = vmatmul.mubr.msk.bf16.vlgmr.msra.gmra.mrb[28].mxu1 %vm563_vm3, %v1342_v54  ;;  %v2192_v24 = vld [vmem:[%s2409_s11] sm:$0xff]   ;;  %v1567_v54 = vsub.s32 2, %v2444_v26 }
 0xb07   : > { %2101 = vmatprep.mubr.msk.bf16.mxu1 %vm2297_vm2, %v2296_v17  ;;  %2098 = vmatpush3.bf16.msra.mxu1 %v2190_v57  ;;  %v1573_v57 = vsub.s32 3, %v2444_v26 }
 0xb08   : > { %v1343_v46 = vpack.c.bf16 %v1341_v56, %v1341_v56  ;;  %2099 = vmatprep.subr.bf16.mxu1 %v2296_v17  ;;  %v1568_v56 = vrot.slane %v2448_v28, %v1567_v54 }
 0xb0a   : > { %2094 = vmatmul.mubr.msk.bf16.vlgmr.msra.gmra.mrb[32].mxu0 %vm563_vm3, %v1343_v46 }
 0xb0b   : > { %2109 = vmatprep.mubr.msk.bf16.mxu0 %vm2297_vm2, %v2296_v17  ;;  %2100 = vmatpush3.bf16.msra.mxu1 %v2191_v58 }
 0xb0c   : > { %2113 = vmatprep.subr.bf16.mxu1 %v2296_v17  ;;  %2106 = vmatpush3.bf16.msra.mxu0 %v2192_v24 }
 0xb0d   : > { %2107 = vmatprep.subr.bf16.mxu0 %v2296_v17 }
 0xb10   : > { %2108 = vmatpush3.bf16.msra.mxu0 %v2193_v25 }
 0xbd9   : > { %v1386_v59 = vpop.f32.mrb[28].mxu1 }
 0xbda   : > { %v2089_v60 = vpop.f32.mrb[29].mxu1 }
 0xbdb   : > { %v1389_v61 = vpop.f32.mrb[30].mxu1 }
 0xbdc   : > { %v2090_v62 = vpop.f32.mrb[31].mxu1  ;;  %v1574_v61 = vrot.slane %v2448_v28, %v1573_v57 }
 0xbdd   : > { %v1434_v63 = vpop.f32.mrb[32].mxu0 }
 0xbde   : > { %v2183_v0 = vpack.i.bf16 %v1434_v63, %v1386_v59  ;;  %v2095_v1 = vpop.f32.mrb[33].mxu0 }
 0xbdf   : > { %v1437_v4 = vpop.f32.mrb[34].mxu0 }
 0xbe0   : > { %2184 = vrot.lane.b32.xlu0 %v2183_v0, %s2311_s17  ;;  %v2096_v5 = vpop.f32.mrb[35].mxu0  ;;  %v2194_v4 = vld [vmem:[%s2414_s19] sm:$0xff]  }
 0xbe1   : > { %v2195_v5 = vld [vmem:[%s2414_s19 + $0x8] sm:$0xff]   ;;  %s2699_s19 = sadd.s32 4294967295, %s2294_s29  }
 0xbe2   : > { %p2651_p6 = scmp.eq.s32.totalorder %s2699_s19, 1 }
 0xbe4   : > { %p2244_p8 = pnand %p2243_p7, %p2651_p6 }
 0xbe6   : > { %p2245_p9 = pneg %p2244_p8 }
 0xbe8   : > { %p2252_p13 = pnand %p2251_p12, %p2245_p9 }
 0xc52   : > { %v2185_v12 = vpop.permute.xlu0 %2184 }
 0xc53   : > { %v2187_v15 = vunpack.i.h.bf16 %v2185_v12  ;;  %v2186_v16 = vunpack.i.l.bf16 %v2185_v12 }
 0xc55   : > { %v1471_v21 = vsel %vm1469_vm6, %v1468_v19, %v2187_v15  ;;  %v1470_v22 = vsel %vm1469_vm6, %v1467_v18, %v2186_v16 }
 0xc56   : > { %v1472_v23 = vpack.c.bf16 %v1471_v21, %v1470_v22 }
 0xc58   : > { %2102 = vmatmul.mubr.msk.bf16.vlgmr.msra.gmra.mrb[32].mxu1 %vm450_vm1, %v1472_v23 }
 0xc59   : > { %2121 = vmatprep.mubr.msk.bf16.mxu1 %vm2297_vm2, %v2296_v17  ;;  %2114 = vmatpush3.bf16.msra.mxu1 %v2194_v4 }
 0xc5a   : > { %2115 = vmatprep.subr.bf16.mxu1 %v2296_v17 }
 0xc5d   : > { %2116 = vmatpush3.bf16.msra.mxu1 %v2195_v5 }
 0xc5e   : > { %2117 = vmatprep.subr.bf16.mxu1 %v2296_v17 }
 0xc61   : > { %2118 = vmatpush3.bf16.msra.mxu1 %v2196_v6 }
 0xc62   : > { %2119 = vmatprep.subr.bf16.mxu1 %v2296_v17 }
 0xc65   : > { %2120 = vmatpush3.bf16.msra.mxu1 %v2197_v7 }
 0xd2b   : > { %v1530_v36 = vpop.f32.mrb[32].mxu1 }
 0xd2c   : > { %v1531_v30 = vadd.f32 %v1530_v36, %v1480_v29  ;;  %v2103_v31 = vpop.f32.mrb[33].mxu1 }
 0xd2d   : > { %v1533_v33 = vpop.f32.mrb[34].mxu1 }
 0xd2e   : > { %v2613_v32 = vadd.f32 %v1531_v30, %v2422_v2  ;;  %v1534_v34 = vadd.f32 %v1533_v33, %v1480_v29  ;;  %v2104_v35 = vpop.f32.mrb[35].mxu1 }
 0xd30   : > { %v2616_v37 = vadd.f32 %v1534_v34, %v2424_v3  ;;  %v1539_v38 = vsel %vm450_vm1, %v2613_v32, 0.0 }
 0xd31   : > { %1540 = vadd.xlane.f32.xlu1 %v1539_v38 }
 0xd32   : > { %v1542_v39 = vsel %vm450_vm1, %v2616_v37, 0.0 }
 0xd33   : > { %1543 = vadd.xlane.f32.xlu0 %v1542_v39 }
 0xdbe   : > { %v1541_v40 = vpop.xlane.xlu1 %1540 }
 0xdbf   : > { %v1545_v41 = vmul.f32 0.03125, %v1541_v40 }
 0xdc0   : > { %v1544_v42 = vpop.xlane.xlu0 %1543 }
 0xdc1   : > { %v1547_v2 = vsub.f32 %v2613_v32, %v1545_v41  ;;  %v1546_v43 = vmul.f32 0.03125, %v1544_v42  ;;  %v1674_v41 = vsub.s32 5, %v2444_v26 }
 0xdc3   : > { %v1548_v44 = vsub.f32 %v2616_v37, %v1546_v43  ;;  %v1549_v3 = vmul.f32 %v1547_v2, %v1547_v2  ;;  %v1675_v42 = vrot.slane %v2448_v28, %v1674_v41 }
 0xdc5   : > { %v1551_v45 = vsel %vm450_vm1, %v1549_v3, 0.0  ;;  %v1550_v49 = vmul.f32 %v1548_v44, %v1548_v44 }
 0xdc6   : > { %1552 = vadd.xlane.f32.xlu0 %v1551_v45 }
 0xdc7   : > { %v1554_v20 = vsel %vm450_vm1, %v1550_v49, 0.0 }
 0xdca   : > { %1555 = vadd.xlane.f32.xlu0 %v1554_v20 }
 0xe53   : > { %v1553_v47 = vpop.xlane.xlu0 %1552 }
 0xe54   : > { %v1557_v48 = vmul.f32 0.03125, %v1553_v47 }
 0xe56   : > { %v1559_v50 = vadd.f32 1e-05, %v1557_v48 }
 0xe57   : > { %v1556_v51 = vpop.xlane.xlu0 %1555 }
 0xe58   : > { %2234 = vrsqrt.f32 %v1559_v50  ;;  %v1558_v52 = vmul.f32 0.03125, %v1556_v51 }
 0xe5a   : > { %v1560_v53 = vadd.f32 1e-05, %v1558_v52 }
 0xe5c   : > { %2236 = vrsqrt.f32 %v1560_v53 }
 0xe62   : > { %v2235_v55 = vpop.eup %2234 }
 0xe63   : > { %v1563_v46 = vmul.f32 %v2235_v55, %v1547_v2 }
 0xe65   : > { %v1569_v59 = vmul.f32 %v1568_v56, %v1563_v46 }
 0xe66   : > { %v2237_v58 = vpop.eup %2236 }
 0xe67   : > { %v1564_v60 = vmul.f32 %v2237_v58, %v1548_v44  ;;  %v1575_v63 = vadd.f32 %v1574_v61, %v1569_v59 }
 0xe69   : > { %v1570_v62 = vmul.f32 %v1568_v56, %v1564_v60 }
 0xe6b   : > { %v1576_v0 = vadd.f32 %v1574_v61, %v1570_v62 }
 0xe6d   : > { %v1577_v1 = vpack.c.bf16 %v1576_v0, %v1575_v63 }
 0xe6f   : > { %2110 = vmatmul.mubr.msk.bf16.vlgmr.msra.gmra.mrb[36].mxu0 %vm450_vm1, %v1577_v1 }
 0xf42   : > { %v1638_v9 = vpop.f32.mrb[36].mxu0 }
 0xf43   : > { %v1639_v10 = vadd.f32 %v1930_v8, %v1638_v9  ;;  %v2111_v11 = vpop.f32.mrb[37].mxu0 }
 0xf44   : > { %v1641_v12 = vpop.f32.mrb[38].mxu0 }
 0xf45   : > { %v1647_v13 = vmul.f32 %v1639_v10, %v1639_v10  ;;  %v1642_v14 = vadd.f32 %v1930_v8, %v1641_v12  ;;  %v2112_v15 = vpop.f32.mrb[39].mxu0  ;;  %v1645_v33 = vmul.f32 0.5, %v1639_v10 }
 0xf47   : > { %v1649_v16 = vmul.f32 %v1647_v13, %v1639_v10  ;;  %v1648_v18 = vmul.f32 %v1642_v14, %v1642_v14  ;;  %v1646_v34 = vmul.f32 0.5, %v1642_v14 }
 0xf49   : > { %v1651_v19 = vmul.f32 0.044715, %v1649_v16  ;;  %v1650_v21 = vmul.f32 %v1648_v18, %v1642_v14 }
 0xf4b   : > { %v1653_v22 = vadd.f32 %v1651_v19, %v1639_v10  ;;  %v1652_v17 = vmul.f32 0.044715, %v1650_v21 }
 0xf4d   : > { %v1655_v23 = vmul.f32 0.7978846, %v1653_v22  ;;  %v1654_v27 = vadd.f32 %v1652_v17, %v1642_v14 }
 0xf4f   : > { %2238 = vtanh.f32 %v1655_v23  ;;  %v1656_v29 = vmul.f32 0.7978846, %v1654_v27 }
 0xf51   : > { %2240 = vtanh.f32 %v1656_v29 }
 0xf59   : > { %v2239_v36 = vpop.eup %2238 }
 0xf5a   : > { %v1659_v30 = vadd.f32 1.0, %v2239_v36 }
 0xf5b   : > { %v2241_v31 = vpop.eup %2240 }
 0xf5c   : > { %v1660_v35 = vadd.f32 1.0, %v2241_v31  ;;  %v1661_v38 = vmul.f32 %v1659_v30, %v1645_v33 }
 0xf5e   : > { %v1662_v39 = vmul.f32 %v1660_v35, %v1646_v34 }
 0xf60   : > { %v1663_v40 = vpack.c.bf16 %v1662_v39, %v1661_v38 }
 0xf62   : > { %2122 = vmatmul.mubr.msk.bf16.vlgmr.msra.gmra.mrb[36].mxu1 %vm1700_vm7, %v1663_v40 }
0x1035   : > { %v1738_v2 = vpop.f32.mrb[36].mxu1 }
0x1036   : > { %v1739_v43 = vadd.f32 %v1738_v2, %v1675_v42  ;;  %v2123_v44 = vpop.f32.mrb[37].mxu1 }
0x1037   : > { %v1741_v3 = vpop.f32.mrb[38].mxu1 }
0x1038   : > { %v1745_v45 = vadd.f32 %v1739_v43, %v2613_v32  ;;  %v1742_v49 = vadd.f32 %v1741_v3, %v1675_v42  ;;  %v2124_v20 = vpop.f32.mrb[39].mxu1 }
0x103a   : > { %1747 = vst.msk [vmem:[#allocation2] sm:$0xff] %vm450_vm1, %v1745_v45  ;;  %v1746_v26 = vadd.f32 %v1742_v49, %v2616_v37 }
0x103c   : > { %1748 = vst.msk [vmem:[#allocation2 + $0x8] sm:$0xff] %vm450_vm1, %v1746_v26 }
0x103d   : > { %2255 = shalt.err (!%p2252_p13)
}
0x103e   : > { %s2256_s13 = scalar_lea.hbm %s2698_s8, 256 }
0x103f   : > { %p2257_p0 = scmp.ne.s32.totalorder %s2698_s8, %s2256_s13  ;;  %p2262_p3 = scmp.lt.u32.totalorder %s2256_s13, %s2698_s8 }
0x1041   : > { %p2258_p1 = pnand %p2257_p0, %p2651_p6 }
0x1043   : > { %p2259_p2 = pneg %p2258_p1 }
0x1045   : > { %p2264_p4 = pnand %p2262_p3, %p2259_p2 }
0x1047   : > { %2267 = shalt.err (!%p2264_p4)
}
0x1048   : > { %s2313_s24 = smov 128  }
0x1049   : > { %2126 = dma.vmem_to_hbm [thread:$0]  (%p2651_p6), %s1759_s20, 256, %s2698_s8, [#allocation3], %s2313_s24, %s2313_s24, %s2309_s26  }
0x104a   : > { %2281 = dma.done.wait (%p2651_p6), [#allocation3], 256  }
0x104b   : > { %2283 = vsyncadd (%p2651_p6), [#allocation3], 4294967040 }
0x104c PF: > { %s19_s29 = sadd.s32 1, %s2294_s29   ;;  %s2701_s27 = smov %s2290_s28 }
0x104d   : > { %p16_p5 = scmp.ge.s32.totalorder %s19_s29, 4   ;;  %s2702_s28 = smov %s2704_s9 }
0x104f   :  { %18 = sbr.rel (!%p16_p5) target bundleno = 2 (0x2), region = 105 }
0x1056   :  { %1774 = vsyncpa [#allocation3], 1 }
0x1057   :  { %1776 = vsyncpa [#allocation3 + $0x1], 1 }

</bundles_post_ra>
